<compile_context>
chip_gen: v6e
topology: v6e:2x2x1
jax: 0.10.0
libtpu: 0.0.40
codegen_flags: <defaults>
</compile_context>

<pallas_src>
import jax
import jax.numpy as jnp
from jax.experimental import pallas as pl
from jax.experimental.pallas import tpu as pltpu


def _pick_tile(total, preferred):
    """Largest divisor of `total` <= `preferred` that is a multiple of 8 (sublane
    tiling rule) or equal to `total` itself (full dim is always legal)."""
    t = max(1, min(preferred, total))
    while t > 1:
        if total % t == 0 and (t % 8 == 0 or t == total):
            return t
        t -= 1
    return total


# --------------------------------------------------------------------------
# Kernel 1: fused Q/K/V projection (1x1 convs == channel matmuls), one wide
#           lane-dense matmul with bias fused into the epilogue.
# --------------------------------------------------------------------------
def _qkv_proj_kernel(x_ref, w_ref, b_ref, o_ref):
    # x is streamed as f32 and cast to bf16 in-kernel (free VPU op) -> no extra
    # wrapper-level HBM cast pass; the MXU matmul accumulates in f32.
    x = x_ref[...].astype(jnp.bfloat16)
    acc = jnp.dot(x, w_ref[...], preferred_element_type=jnp.float32)
    o_ref[...] = (acc + b_ref[...]).astype(o_ref.dtype)


def qkv_projection(x_flat, params, tm=1024):
    """x_flat: (B, N, C) f32 -> q, k: (B, N, C//8) bf16 ; v: (B, N, C) bf16."""
    B, N, C = x_flat.shape
    Dq = params['wq'].shape[0]
    Dout = 2 * Dq + C
    M = B * N
    tm = _pick_tile(M, tm)

    xf = x_flat.reshape(M, C)                                      # stays f32 in HBM
    # Fused weight [wq | wk | wv] -> one wide output block instead of 3 narrow ones.
    w = jnp.concatenate([params['wq'].T, params['wk'].T, params['wv'].T],
                        axis=1).astype(jnp.bfloat16)               # (C, Dout)
    b = jnp.concatenate([params['bq'], params['bk'], params['bv']]
                        ).reshape(1, Dout).astype(jnp.float32)

    # TODO(synk): for deployed configs make Dout a multiple of 128 (pad the fused
    # weight) so the output store is fully lane-dense; C=32 demo is inherently narrow.
    qkv = pl.pallas_call(
        _qkv_proj_kernel,
        out_shape=jax.ShapeDtypeStruct((M, Dout), jnp.bfloat16),
        grid_spec=pltpu.PrefetchScalarGridSpec(
            num_scalar_prefetch=0,
            grid=(M // tm,),
            in_specs=[
                pl.BlockSpec((tm, C), lambda i: (i, 0)),     # streamed activations
                pl.BlockSpec((C, Dout), lambda i: (0, 0)),   # resident fused weight
                pl.BlockSpec((1, Dout), lambda i: (0, 0)),   # resident fused bias
            ],
            out_specs=pl.BlockSpec((tm, Dout), lambda i: (i, 0))),
        compiler_params=pltpu.CompilerParams(
            dimension_semantics=("parallel",)),
        cost_estimate=pl.CostEstimate(
            flops=int(2 * M * C * Dout),
            transcendentals=0,
            bytes_accessed=int(M * C * 4 + C * Dout * 2 + M * Dout * 2)),
    )(xf, w, b)

    q = qkv[:, :Dq].reshape(B, N, Dq)
    k = qkv[:, Dq:2 * Dq].reshape(B, N, Dq)
    v = qkv[:, 2 * Dq:].reshape(B, N, C)
    return q, k, v


# --------------------------------------------------------------------------
# Kernel 2a: K/V sequence-resident attention (single softmax, no ki axis)
#            with fused gamma*out + x residual epilogue.
# --------------------------------------------------------------------------
def _attn_resident_kernel(gamma_ref, q_ref, k_ref, v_ref, x_ref, o_ref):
    # q: (tq, Dq) bf16 ; k: (N, Dq) bf16 resident ; v: (N, C) bf16 resident.
    s = jax.lax.dot_general(q_ref[...], k_ref[...], (((1,), (1,)), ((), ())),
                            preferred_element_type=jnp.float32)        # (tq, N)
    m = jnp.max(s, axis=-1, keepdims=True)
    p = jnp.exp(s - m)
    l = jnp.sum(p, axis=-1, keepdims=True)
    num = jnp.dot(p.astype(v_ref.dtype), v_ref[...],
                  preferred_element_type=jnp.float32)                   # (tq, C)
    attn_out = num * pl.reciprocal(l, approx=True)
    # Fused residual epilogue: gamma * attention_output + x
    o_ref[...] = (gamma_ref[0] * attn_out + x_ref[...]).astype(o_ref.dtype)


# --------------------------------------------------------------------------
# Kernel 2b: flash-style online-softmax fallback for large N.
# --------------------------------------------------------------------------
def _attn_flash_kernel(gamma_ref, q_ref, k_ref, v_ref, x_ref, o_ref,
                       m_sc, l_sc, acc_sc):
    ki = pl.program_id(2)

    @pl.when(ki == 0)
    def _():
        m_sc[...] = jnp.full_like(m_sc, -jnp.inf)
        l_sc[...] = jnp.zeros_like(l_sc)
        acc_sc[...] = jnp.zeros_like(acc_sc)

    s = jax.lax.dot_general(q_ref[...], k_ref[...], (((1,), (1,)), ((), ())),
                            preferred_element_type=jnp.float32)        # (tq, tk)
    m_prev = m_sc[...]
    m_new = jnp.maximum(m_prev, jnp.max(s, axis=-1, keepdims=True))
    alpha = jnp.exp(m_prev - m_new)
    p = jnp.exp(s - m_new)
    l_sc[...] = alpha * l_sc[...] + jnp.sum(p, axis=-1, keepdims=True)
    acc_sc[...] = alpha * acc_sc[...] + jnp.dot(
        p.astype(v_ref.dtype), v_ref[...], preferred_element_type=jnp.float32)
    m_sc[...] = m_new

    @pl.when(ki == pl.num_programs(2) - 1)
    def _():
        attn_out = acc_sc[...] * pl.reciprocal(l_sc[...], approx=True)
        o_ref[...] = (gamma_ref[0] * attn_out + x_ref[...]).astype(o_ref.dtype)


# Conservative budget so full K/V residency also fits v7x (64 MiB physical VMEM,
# 32 MiB default scoped) without buffer shrinkage; v5e/v6e have 128 MiB.
_RESIDENT_VMEM_BUDGET = 40 << 20


def _resident_vmem_bytes(tq, N, Dq, C):
    # Every BlockSpec operand is double-buffered by the pipeline.
    per_buf = (tq * Dq * 2      # q tile (bf16)
               + N * Dq * 2     # resident K (bf16)
               + N * C * 2      # resident V (bf16)
               + tq * C * 4     # x residual tile (f32)
               + tq * C * 4)    # output tile (f32)
    return 2 * per_buf


def _default_tk():
    # v6e/v7x MXU contraction depth is 256 -> tk=256 fills it; v5e (4x128^2) is
    # already filled by tk=128 and has no bf16 VPU, so keep 128 there.
    try:
        kind = jax.devices()[0].device_kind.lower()
    except Exception:
        return 128
    if any(v in kind for v in ("v2", "v3", "v4", "v5")):
        return 128
    return 256


def attention_residual(q, k, v, x_flat, gamma, tq=128, tk=None):
    B, N, Dq = q.shape
    C = v.shape[-1]
    tq = _pick_tile(N, tq)

    gamma_arr = jnp.asarray(gamma, jnp.float32).reshape(1,)
    gamma_spec = pl.BlockSpec(memory_space=pltpu.MemorySpace.SMEM)   # scalar, no DMA stream

    resident_bytes = _resident_vmem_bytes(tq, N, Dq, C)
    if resident_bytes <= _RESIDENT_VMEM_BUDGET:
        # ---- K/V sequence-resident path: K/V DMA'd once per batch, single softmax ----
        vmem_limit = None
        if resident_bytes > (28 << 20):          # above the ~32 MiB default scoped limit
            vmem_limit = min(int(resident_bytes * 1.25) + (4 << 20), 60 << 20)
        cost = pl.CostEstimate(
            flops=int(2 * B * N * N * (Dq + C)),
            transcendentals=int(B * N * N),
            bytes_accessed=int(B * (N * Dq * 2 + N * Dq * 2 + N * C * 2
                                    + N * C * 4 + N * C * 4)))
        return pl.pallas_call(
            _attn_resident_kernel,
            out_shape=jax.ShapeDtypeStruct((B, N, C), jnp.float32),
            grid_spec=pltpu.PrefetchScalarGridSpec(
                num_scalar_prefetch=0,
                grid=(B, N // tq),
                in_specs=[
                    gamma_spec,                                                # gamma (SMEM)
                    pl.BlockSpec((None, tq, Dq), lambda b, qi: (b, qi, 0)),    # q tile
                    pl.BlockSpec((None, N, Dq), lambda b, qi: (b, 0, 0)),      # K resident
                    pl.BlockSpec((None, N, C), lambda b, qi: (b, 0, 0)),       # V resident
                    pl.BlockSpec((None, tq, C), lambda b, qi: (b, qi, 0)),     # x residual
                ],
                out_specs=pl.BlockSpec((None, tq, C), lambda b, qi: (b, qi, 0))),
            compiler_params=pltpu.CompilerParams(
                dimension_semantics=("parallel", "parallel"),
                vmem_limit_bytes=vmem_limit),
            cost_estimate=cost,
        )(gamma_arr, q, k, v, x_flat)

    # ---- flash/online-softmax fallback for large N ----
    if tk is None:
        tk = _default_tk()
    tk = _pick_tile(N, tk)
    cost = pl.CostEstimate(
        flops=int(2 * B * N * N * (Dq + C)),
        transcendentals=int(B * N * N),
        bytes_accessed=int(B * (N * Dq * 2
                                + (N // tq) * (N * Dq * 2 + N * C * 2)   # K/V re-streamed
                                + N * C * 4 + N * C * 4)))
    return pl.pallas_call(
        _attn_flash_kernel,
        out_shape=jax.ShapeDtypeStruct((B, N, C), jnp.float32),
        grid_spec=pltpu.PrefetchScalarGridSpec(
            num_scalar_prefetch=0,
            grid=(B, N // tq, N // tk),
            in_specs=[
                gamma_spec,
                pl.BlockSpec((None, tq, Dq), lambda b, qi, ki: (b, qi, 0)),
                pl.BlockSpec((None, tk, Dq), lambda b, qi, ki: (b, ki, 0)),
                pl.BlockSpec((None, tk, C), lambda b, qi, ki: (b, ki, 0)),
                pl.BlockSpec((None, tq, C), lambda b, qi, ki: (b, qi, 0)),
            ],
            out_specs=pl.BlockSpec((None, tq, C), lambda b, qi, ki: (b, qi, 0)),
            scratch_shapes=[pltpu.VMEM((tq, 1), jnp.float32),    # running max
                            pltpu.VMEM((tq, 1), jnp.float32),    # running denominator
                            pltpu.VMEM((tq, C), jnp.float32)]),  # running numerator
        compiler_params=pltpu.CompilerParams(
            dimension_semantics=("parallel", "parallel", "arbitrary")),
        cost_estimate=cost,
    )(gamma_arr, q, k, v, x_flat)


# --------------------------------------------------------------------------
# Forward pass, pure-JAX reference, and parameter init
# --------------------------------------------------------------------------
def self_attention_forward(params, x_nchw):
    B, C, W, H = x_nchw.shape
    N = W * H
    # NCHW -> (B, N, C) with n = w*H + h (same flattening order as torch .view).
    x_flat = jnp.transpose(x_nchw, (0, 2, 3, 1)).reshape(B, N, C).astype(jnp.float32)
    q, k, v = qkv_projection(x_flat, params)
    out_flat = attention_residual(q, k, v, x_flat, params['gamma'])
    return jnp.transpose(out_flat.reshape(B, W, H, C), (0, 3, 1, 2))


def self_attention_reference(params, x_nchw):
    """Pure-JAX f32 reference matching the PyTorch module exactly."""
    B, C, W, H = x_nchw.shape
    N = W * H
    xf = x_nchw.reshape(B, C, N).astype(jnp.float32)
    q = jnp.einsum('dc,bcn->bdn', params['wq'], xf) + params['bq'][None, :, None]
    k = jnp.einsum('dc,bcn->bdn', params['wk'], xf) + params['bk'][None, :, None]
    v = jnp.einsum('oc,bcn->bon', params['wv'], xf) + params['bv'][None, :, None]
    energy = jnp.einsum('bdn,bdm->bnm', q, k)           # q^T k (no 1/sqrt(d) in module)
    attn = jax.nn.softmax(energy, axis=-1)
    out = jnp.einsum('bcm,bnm->bcn', v, attn)           # v @ attn^T
    return params['gamma'][0] * out.reshape(B, C, W, H) + x_nchw


def init_params(key, in_channels):
    c8 = max(in_channels // 8, 1)
    ks = jax.random.split(key, 6)
    s = 0.1
    return {
        'wq': jax.random.normal(ks[0], (c8, in_channels), jnp.float32) * s,
        'bq': jax.random.normal(ks[1], (c8,), jnp.float32) * s,
        'wk': jax.random.normal(ks[2], (c8, in_channels), jnp.float32) * s,
        'bk': jax.random.normal(ks[3], (c8,), jnp.float32) * s,
        'wv': jax.random.normal(ks[4], (in_channels, in_channels), jnp.float32) * s,
        'bv': jax.random.normal(ks[5], (in_channels,), jnp.float32) * s,
        # PyTorch inits gamma to 0 (output == x); use a nonzero value so the
        # attention path is actually exercised and validated. Semantics unchanged
        # (deployed code must load the trained gamma).
        'gamma': jnp.full((1,), 0.8, jnp.float32),
    }


if __name__ == "__main__":
    B, C, W, H = 2, 32, 16, 16          # in_channels=32 -> C//8 = 4, N = 256
    key = jax.random.PRNGKey(0)
    kx, kp = jax.random.split(key)
    x = jax.random.normal(kx, (B, C, W, H), jnp.float32)
    params = init_params(kp, C)

    fwd = jax.jit(self_attention_forward)
    out = jax.block_until_ready(fwd(params, x))

    assert out.shape == (B, C, W, H), out.shape
    assert bool(jnp.all(jnp.isfinite(out)))

    ref = self_attention_reference(params, x)
    max_err = float(jnp.max(jnp.abs(out - ref)))
    # bf16 matmul operands with f32 accumulation + approx reciprocal -> small diff.
    assert max_err < 5e-2, f"max abs error vs reference: {max_err}"
    print("KERNEL_OK")
</pallas_src>

<mosaic_0001>
module attributes {stable_mosaic.version = 11 : i64} {
  func.func @_qkv_proj_kernel(%arg0: i32, %arg1: memref<512x32xf32, #tpu.memory_space<vmem>>, %arg2: memref<32x40xbf16, #tpu.memory_space<vmem>>, %arg3: memref<1x40xf32, #tpu.memory_space<vmem>>, %arg4: memref<512x40xbf16, #tpu.memory_space<vmem>>) attributes {dimension_semantics = [#tpu.dimension_semantics<parallel>], iteration_bounds = array<i64: 1>, scalar_prefetch = 0 : i64, scratch_operands = 0 : i64, tpu.core_type = #tpu.core_type<tc>, window_params = [{transform_indices = @transform_0, window_bounds = array<i64: 512, 32>}, {pipeline_mode = #tpu.pipeline_mode<synchronous>, transform_indices = @transform_1, window_bounds = array<i64: 32, 40>}, {pipeline_mode = #tpu.pipeline_mode<synchronous>, transform_indices = @transform_2, window_bounds = array<i64: 1, 40>}, {transform_indices = @transform_3, window_bounds = array<i64: 512, 40>}]} {
    %c0 = arith.constant 0 : index
    %c0_0 = arith.constant 0 : index
    %0 = vector.load %arg1[%c0, %c0_0] : memref<512x32xf32, #tpu.memory_space<vmem>>, vector<512x32xf32>
    %1 = arith.truncf %0 : vector<512x32xf32> to vector<512x32xbf16>
    %c0_1 = arith.constant 0 : index
    %c0_2 = arith.constant 0 : index
    %2 = vector.load %arg2[%c0_1, %c0_2] : memref<32x40xbf16, #tpu.memory_space<vmem>>, vector<32x40xbf16>
    %cst = arith.constant dense<0.000000e+00> : vector<512x40xf32>
    %3 = tpu.matmul %1, %2, %cst {dimension_numbers = #tpu.dot_dimension_numbers<[1], [0], [0], [1], [0, 0, 1, 1], [], []>} : vector<512x32xbf16>, vector<32x40xbf16>, vector<512x40xf32> -> vector<512x40xf32>
    %c0_3 = arith.constant 0 : index
    %c0_4 = arith.constant 0 : index
    %4 = vector.load %arg3[%c0_3, %c0_4] : memref<1x40xf32, #tpu.memory_space<vmem>>, vector<1x40xf32>
    %5 = vector.broadcast %4 : vector<1x40xf32> to vector<512x40xf32>
    %6 = arith.addf %3, %5 : vector<512x40xf32>
    %7 = arith.truncf %6 : vector<512x40xf32> to vector<512x40xbf16>
    %c0_5 = arith.constant 0 : index
    %c0_6 = arith.constant 0 : index
    %8 = vector.load %arg4[%c0_5, %c0_6] : memref<512x40xbf16, #tpu.memory_space<vmem>>, vector<512x40xbf16>
    tpu.vector_store %arg4[%c0_5, %c0_6], %7 {strides = array<i32>} : memref<512x40xbf16, #tpu.memory_space<vmem>>, vector<512x40xbf16>,
    return
  }
  func.func @transform_0(%arg0: i32) -> (i32, i32) {
    %c0_i32 = arith.constant 0 : i32
    %c0_i32_0 = arith.constant 0 : i32
    return %arg0, %c0_i32 : i32, i32
  }
  func.func @transform_1(%arg0: i32) -> (i32, i32) {
    %c0_i32 = arith.constant 0 : i32
    %c0_i32_0 = arith.constant 0 : i32
    %c0_i32_1 = arith.constant 0 : i32
    return %c0_i32, %c0_i32_0 : i32, i32
  }
  func.func @transform_2(%arg0: i32) -> (i32, i32) {
    %c0_i32 = arith.constant 0 : i32
    %c0_i32_0 = arith.constant 0 : i32
    %c0_i32_1 = arith.constant 0 : i32
    return %c0_i32, %c0_i32_0 : i32, i32
  }
  func.func @transform_3(%arg0: i32) -> (i32, i32) {
    %c0_i32 = arith.constant 0 : i32
    %c0_i32_0 = arith.constant 0 : i32
    return %arg0, %c0_i32 : i32, i32
  }
}

module attributes {stable_mosaic.version = 11 : i64} {
  func.func @_attn_resident_kernel(%arg0: i32, %arg1: i32, %arg2: memref<1xf32, #tpu.memory_space<smem>>, %arg3: memref<1x128x4xbf16, #tpu.memory_space<vmem>>, %arg4: memref<1x256x4xbf16, #tpu.memory_space<vmem>>, %arg5: memref<1x256x32xbf16, #tpu.memory_space<vmem>>, %arg6: memref<1x128x32xf32, #tpu.memory_space<vmem>>, %arg7: memref<1x128x32xf32, #tpu.memory_space<vmem>>) attributes {dimension_semantics = [#tpu.dimension_semantics<parallel>, #tpu.dimension_semantics<parallel>], iteration_bounds = array<i64: 2, 2>, scalar_prefetch = 0 : i64, scratch_operands = 0 : i64, tpu.core_type = #tpu.core_type<tc>, window_params = [{transform_indices = @transform_0, window_bounds = array<i64: 1>}, {transform_indices = @transform_1, window_bounds = array<i64: 1, 128, 4>}, {transform_indices = @transform_2, window_bounds = array<i64: 1, 256, 4>}, {transform_indices = @transform_3, window_bounds = array<i64: 1, 256, 32>}, {transform_indices = @transform_4, window_bounds = array<i64: 1, 128, 32>}, {transform_indices = @transform_5, window_bounds = array<i64: 1, 128, 32>}]} {
    %c0 = arith.constant 0 : index
    %c0_0 = arith.constant 0 : index
    %c0_1 = arith.constant 0 : index
    %0 = vector.load %arg3[%c0, %c0_0, %c0_1] : memref<1x128x4xbf16, #tpu.memory_space<vmem>>, vector<1x128x4xbf16>
    %1 = vector.shape_cast %0 : vector<1x128x4xbf16> to vector<128x4xbf16>
    %c0_2 = arith.constant 0 : index
    %c0_3 = arith.constant 0 : index
    %c0_4 = arith.constant 0 : index
    %2 = vector.load %arg4[%c0_2, %c0_3, %c0_4] : memref<1x256x4xbf16, #tpu.memory_space<vmem>>, vector<1x256x4xbf16>
    %3 = vector.shape_cast %2 : vector<1x256x4xbf16> to vector<256x4xbf16>
    %cst = arith.constant dense<0.000000e+00> : vector<128x256xf32>
    %4 = tpu.matmul %1, %3, %cst {dimension_numbers = #tpu.dot_dimension_numbers<[1], [1], [0], [0], [0, 0, 1, 0], [], []>} : vector<128x4xbf16>, vector<256x4xbf16>, vector<128x256xf32> -> vector<128x256xf32>
    %cst_5 = arith.constant dense<0xFF800000> : vector<128xf32>
    %5 = vector.multi_reduction <maximumf>, %4, %cst_5 [1] : vector<128x256xf32> to vector<128xf32>
    %6 = vector.shape_cast %5 : vector<128xf32> to vector<128x1xf32>
    %7 = vector.broadcast %6 : vector<128x1xf32> to vector<128x256xf32>
    %8 = arith.subf %4, %7 : vector<128x256xf32>
    %9 = math.exp %8 : vector<128x256xf32>
    %cst_6 = arith.constant dense<0.000000e+00> : vector<128xf32>
    %10 = vector.multi_reduction <add>, %9, %cst_6 [1] : vector<128x256xf32> to vector<128xf32>
    %11 = vector.shape_cast %10 : vector<128xf32> to vector<128x1xf32>
    %12 = arith.truncf %9 : vector<128x256xf32> to vector<128x256xbf16>
    %c0_7 = arith.constant 0 : index
    %c0_8 = arith.constant 0 : index
    %c0_9 = arith.constant 0 : index
    %13 = vector.load %arg5[%c0_7, %c0_8, %c0_9] : memref<1x256x32xbf16, #tpu.memory_space<vmem>>, vector<1x256x32xbf16>
    %14 = vector.shape_cast %13 : vector<1x256x32xbf16> to vector<256x32xbf16>
    %cst_10 = arith.constant dense<0.000000e+00> : vector<128x32xf32>
    %15 = tpu.matmul %12, %14, %cst_10 {dimension_numbers = #tpu.dot_dimension_numbers<[1], [0], [0], [1], [0, 0, 1, 1], [], []>} : vector<128x256xbf16>, vector<256x32xbf16>, vector<128x32xf32> -> vector<128x32xf32>
    %16 = tpu.reciprocal %11 {approx = true} : vector<128x1xf32> -> vector<128x1xf32>
    %17 = vector.broadcast %16 : vector<128x1xf32> to vector<128x32xf32>
    %18 = arith.mulf %15, %17 : vector<128x32xf32>
    %c0_11 = arith.constant 0 : index
    %19 = memref.load %arg2[%c0_11] : memref<1xf32, #tpu.memory_space<smem>>
    %20 = vector.broadcast %19 : f32 to vector<128x32xf32>
    %21 = arith.mulf %20, %18 : vector<128x32xf32>
    %c0_12 = arith.constant 0 : index
    %c0_13 = arith.constant 0 : index
    %c0_14 = arith.constant 0 : index
    %22 = vector.load %arg6[%c0_12, %c0_13, %c0_14] : memref<1x128x32xf32, #tpu.memory_space<vmem>>, vector<1x128x32xf32>
    %23 = vector.shape_cast %22 : vector<1x128x32xf32> to vector<128x32xf32>
    %24 = arith.addf %21, %23 : vector<128x32xf32>
    %c0_15 = arith.constant 0 : index
    %c0_16 = arith.constant 0 : index
    %c0_17 = arith.constant 0 : index
    %25 = vector.load %arg7[%c0_15, %c0_16, %c0_17] : memref<1x128x32xf32, #tpu.memory_space<vmem>>, vector<1x128x32xf32>
    %26 = vector.shape_cast %25 : vector<1x128x32xf32> to vector<128x32xf32>
    %27 = vector.shape_cast %24 : vector<128x32xf32> to vector<1x128x32xf32>
    tpu.vector_store %arg7[%c0_15, %c0_16, %c0_17], %27 {strides = array<i32>} : memref<1x128x32xf32, #tpu.memory_space<vmem>>, vector<1x128x32xf32>,
    return
  }
  func.func @transform_0(%arg0: i32, %arg1: i32) -> i32 {
    %c0_i32 = arith.constant 0 : i32
    %c0_i32_0 = arith.constant 0 : i32
    return %c0_i32 : i32
  }
  func.func @transform_1(%arg0: i32, %arg1: i32) -> (i32, i32, i32) {
    %c0_i32 = arith.constant 0 : i32
    %c0_i32_0 = arith.constant 0 : i32
    return %arg0, %arg1, %c0_i32 : i32, i32, i32
  }
  func.func @transform_2(%arg0: i32, %arg1: i32) -> (i32, i32, i32) {
    %c0_i32 = arith.constant 0 : i32
    %c0_i32_0 = arith.constant 0 : i32
    %c0_i32_1 = arith.constant 0 : i32
    return %arg0, %c0_i32, %c0_i32_0 : i32, i32, i32
  }
  func.func @transform_3(%arg0: i32, %arg1: i32) -> (i32, i32, i32) {
    %c0_i32 = arith.constant 0 : i32
    %c0_i32_0 = arith.constant 0 : i32
    %c0_i32_1 = arith.constant 0 : i32
    return %arg0, %c0_i32, %c0_i32_0 : i32, i32, i32
  }
  func.func @transform_4(%arg0: i32, %arg1: i32) -> (i32, i32, i32) {
    %c0_i32 = arith.constant 0 : i32
    %c0_i32_0 = arith.constant 0 : i32
    return %arg0, %arg1, %c0_i32 : i32, i32, i32
  }
  func.func @transform_5(%arg0: i32, %arg1: i32) -> (i32, i32, i32) {
    %c0_i32 = arith.constant 0 : i32
    %c0_i32_0 = arith.constant 0 : i32
    return %arg0, %arg1, %c0_i32 : i32, i32, i32
  }
}

</mosaic_0001>

<bundles_post_ra>
// kernel: self_attention_forward.2
= control target key start
LH: loop header
LB: loop body
LE: loop exit
PB: predicated region body
PF: predicated region fallthrough
CT: control target
= control target key end

     0   :  { %8 = vsyncpa [#allocation3], 0  ;;  %s1156_s12 = smov [#allocation2]   ;;  %s1545_s0 = inlined_call_operand.hbm [shape: f32[512,32], index: 0, kind: input, shape index: {}]   ;;  %s1546_s1 = inlined_call_operand.vmem [shape: bf16[32,40], index: 1, kind: input, shape index: {}]   ;;  %s1547_s2 = inlined_call_operand.vmem [shape: f32[1,40], index: 2, kind: input, shape index: {}]   ;;  %s1548_s3 = inlined_call_operand.vmem [shape: bf16[512,40], index: 3, kind: output, shape index: {}]  }
   0x1   :  { %s14_s13 = sshll.u32 %s1156_s12, 4  ;;  %s15_s13 = int_to_ptr.vmem [resolvable:$true] %s14_s13 }
   0x2   :  { %s1142_s14 = scalar_lea.vmem %s15_s13, 8192  ;;  %p1147_p1 = scmp.lt.s32.totalorder %s15_s13, %s15_s13 }
   0x3   :  { %p1143_p0 = scmp.ne.s32.totalorder %s15_s13, %s1142_s14  ;;  %p1148_p2 = scmp.lt.s32.totalorder %s1142_s14, %s1142_s14 }
   0x5   :  { %p1149_p3 = por %p1148_p2, %p1147_p1 }
   0x7   :  { %p1150_p4 = pnand %p1149_p3, %p1143_p0 }
   0x9   :  { %1153 = shalt.err (!%p1150_p4)
}
   0xa   :  { %s1157_s15 = smov 128   ;;  %s1158_s16 = smov 8  }
   0xb   :  { %20 = dma.hbm_to_vmem [thread:$0]  %s1545_s0, 8192, %s15_s13, [#allocation3], %s1157_s15, %s1157_s15, %s1158_s16  }
   0xc   :  { %1154 = dma.done.wait [#allocation3], 8192  }
   0xd   :  { %1155 = vsyncadd [#allocation3], 4294959104  ;;  %v1132_v0 = vld [vmem:[%s1546_s1 + $0x8] sm:$0xff]   ;;  %v1133_v1 = vld [vmem:[%s1546_s1] sm:$0xff]   ;;  %vm148_vm0 = vcmask 261120   ;;  %vm790_vm1 = vcmask 322560  }
   0xe   :  { %1057 = vmatprep.subr.bf16.mxu0 %v1132_v0  ;;  %1125 = vmatprep.subr.bf16.mxu1 %v1132_v0  ;;  %v29_v2 = vld [vmem:[#allocation2] sm:$0xff]  ;;  %v30_v3 = vld [vmem:[#allocation2 + $0x8] sm:$0xff]  ;;  %v31_v7 = vld [vmem:[#allocation2 + $0x10] sm:$0xff] }
   0xf   :  { %v61_v4 = vld [vmem:[#allocation2 + $0x100] sm:$0xff]  ;;  %1058 = vmatpush3.bf16.msra.mxu0 %v1132_v0  ;;  %1127 = vmatpush3.bf16.msra.mxu1 %v1132_v0  ;;  %v93_v5 = vpack.c.bf16 %v30_v3, %v29_v2  ;;  %v62_v6 = vld [vmem:[#allocation2 + $0x108] sm:$0xff]  ;;  %v32_v8 = vld [vmem:[#allocation2 + $0x18] sm:$0xff] }
  0x10   :  { %1059 = vmatprep.subr.bf16.mxu0 %v1133_v1  ;;  %1126 = vmatprep.subr.bf16.mxu1 %v1133_v1  ;;  %v109_v9 = vpack.c.bf16 %v62_v6, %v61_v4  ;;  %v63_v10 = vld [vmem:[#allocation2 + $0x110] sm:$0xff]  ;;  %v64_v11 = vld [vmem:[#allocation2 + $0x118] sm:$0xff]  ;;  %v33_v12 = vld [vmem:[#allocation2 + $0x20] sm:$0xff]  ;;  %v94_v16 = vpack.c.bf16 %v32_v8, %v31_v7 }
  0x11   :  { %1061 = vmatprep.mubr.msk.bf16.mxu0 %vm148_vm0, %v93_v5  ;;  %v34_v13 = vld [vmem:[#allocation2 + $0x28] sm:$0xff]  ;;  %v65_v14 = vld [vmem:[#allocation2 + $0x120] sm:$0xff]  ;;  %v110_v17 = vpack.c.bf16 %v64_v11, %v63_v10  ;;  %v35_v20 = vld [vmem:[#allocation2 + $0x30] sm:$0xff] }
  0x12   :  { %v66_v15 = vld [vmem:[#allocation2 + $0x128] sm:$0xff]  ;;  %1093 = vmatprep.mubr.msk.bf16.mxu1 %vm148_vm0, %v109_v9  ;;  %v95_v18 = vpack.c.bf16 %v34_v13, %v33_v12  ;;  %v36_v21 = vld [vmem:[#allocation2 + $0x38] sm:$0xff]  ;;  %v67_v22 = vld [vmem:[#allocation2 + $0x130] sm:$0xff] }
  0x13   :  { %1060 = vmatpush3.bf16.msra.mxu0 %v1133_v1  ;;  %1128 = vmatpush3.bf16.msra.mxu1 %v1133_v1  ;;  %v111_v19 = vpack.c.bf16 %v66_v15, %v65_v14  ;;  %v68_v23 = vld [vmem:[#allocation2 + $0x138] sm:$0xff]  ;;  %v37_v24 = vld [vmem:[#allocation2 + $0x40] sm:$0xff]  ;;  %v38_v25 = vld [vmem:[#allocation2 + $0x48] sm:$0xff]  ;;  %v96_v28 = vpack.c.bf16 %v36_v21, %v35_v20 }
  0x14   :  { %v69_v26 = vld [vmem:[#allocation2 + $0x140] sm:$0xff]  ;;  %v70_v27 = vld [vmem:[#allocation2 + $0x148] sm:$0xff]  ;;  %v112_v29 = vpack.c.bf16 %v68_v23, %v67_v22  ;;  %v97_v30 = vpack.c.bf16 %v38_v25, %v37_v24  ;;  %v39_v32 = vld [vmem:[#allocation2 + $0x50] sm:$0xff] }
  0x15   :  { %v113_v31 = vpack.c.bf16 %v70_v27, %v69_v26  ;;  %v40_v33 = vld [vmem:[#allocation2 + $0x58] sm:$0xff]  ;;  %v71_v34 = vld [vmem:[#allocation2 + $0x150] sm:$0xff]  ;;  %v41_v36 = vld [vmem:[#allocation2 + $0x60] sm:$0xff] }
  0x16   :  { %1062 = vmatmul.mubr.msk.bf16.vlgmr.msra.gmra.mxu0 %vm148_vm0, %v94_v16  ;;  %1094 = vmatmul.mubr.msk.bf16.vlgmr.msra.gmra.mxu1 %vm148_vm0, %v110_v17  ;;  %v72_v35 = vld [vmem:[#allocation2 + $0x158] sm:$0xff]  ;;  %v42_v37 = vld [vmem:[#allocation2 + $0x68] sm:$0xff]  ;;  %v73_v38 = vld [vmem:[#allocation2 + $0x160] sm:$0xff]  ;;  %v98_v40 = vpack.c.bf16 %v40_v33, %v39_v32 }
  0x17   :  { %1065 = vmatprep.mubr.msk.bf16.mxu0 %vm148_vm0, %v95_v18  ;;  %1097 = vmatprep.mubr.msk.bf16.mxu1 %vm148_vm0, %v111_v19  ;;  %v74_v39 = vld [vmem:[#allocation2 + $0x168] sm:$0xff]  ;;  %v114_v41 = vpack.c.bf16 %v72_v35, %v71_v34  ;;  %v99_v42 = vpack.c.bf16 %v42_v37, %v41_v36  ;;  %v43_v44 = vld [vmem:[#allocation2 + $0x70] sm:$0xff]  ;;  %v44_v45 = vld [vmem:[#allocation2 + $0x78] sm:$0xff] }
  0x18   :  { %v115_v43 = vpack.c.bf16 %v74_v39, %v73_v38  ;;  %v75_v46 = vld [vmem:[#allocation2 + $0x170] sm:$0xff]  ;;  %v76_v47 = vld [vmem:[#allocation2 + $0x178] sm:$0xff]  ;;  %v45_v48 = vld [vmem:[#allocation2 + $0x80] sm:$0xff]  ;;  %v100_v52 = vpack.c.bf16 %v44_v45, %v43_v44 }
  0x19   :  { %v46_v49 = vld [vmem:[#allocation2 + $0x88] sm:$0xff]  ;;  %v77_v50 = vld [vmem:[#allocation2 + $0x180] sm:$0xff]  ;;  %v116_v53 = vpack.c.bf16 %v76_v47, %v75_v46  ;;  %v47_v56 = vld [vmem:[#allocation2 + $0x90] sm:$0xff] }
  0x1a   :  { %v78_v51 = vld [vmem:[#allocation2 + $0x188] sm:$0xff]  ;;  %v101_v54 = vpack.c.bf16 %v46_v49, %v45_v48  ;;  %v48_v57 = vld [vmem:[#allocation2 + $0x98] sm:$0xff]  ;;  %v79_v58 = vld [vmem:[#allocation2 + $0x190] sm:$0xff] }
  0x1b   :  { %v117_v55 = vpack.c.bf16 %v78_v51, %v77_v50  ;;  %v80_v59 = vld [vmem:[#allocation2 + $0x198] sm:$0xff]  ;;  %v49_v60 = vld [vmem:[#allocation2 + $0xa0] sm:$0xff]  ;;  %v50_v61 = vld [vmem:[#allocation2 + $0xa8] sm:$0xff]  ;;  %v102_v0 = vpack.c.bf16 %v48_v57, %v47_v56 }
  0x1c   :  { %v81_v62 = vld [vmem:[#allocation2 + $0x1a0] sm:$0xff]  ;;  %v82_v63 = vld [vmem:[#allocation2 + $0x1a8] sm:$0xff]  ;;  %v118_v1 = vpack.c.bf16 %v80_v59, %v79_v58  ;;  %v103_v2 = vpack.c.bf16 %v50_v61, %v49_v60  ;;  %v51_v4 = vld [vmem:[#allocation2 + $0xb0] sm:$0xff] }
  0x1d   :  { %v119_v3 = vpack.c.bf16 %v82_v63, %v81_v62  ;;  %v52_v5 = vld [vmem:[#allocation2 + $0xb8] sm:$0xff]  ;;  %v83_v6 = vld [vmem:[#allocation2 + $0x1b0] sm:$0xff]  ;;  %v53_v8 = vld [vmem:[#allocation2 + $0xc0] sm:$0xff] }
  0x1e   :  { %1066 = vmatmul.mubr.msk.bf16.gmra.mxu0 %vm148_vm0, %v96_v28  ;;  %1098 = vmatmul.mubr.msk.bf16.gmra.mxu1 %vm148_vm0, %v112_v29  ;;  %v84_v7 = vld [vmem:[#allocation2 + $0x1b8] sm:$0xff]  ;;  %v54_v9 = vld [vmem:[#allocation2 + $0xc8] sm:$0xff]  ;;  %v85_v10 = vld [vmem:[#allocation2 + $0x1c0] sm:$0xff]  ;;  %v104_v12 = vpack.c.bf16 %v52_v5, %v51_v4 }
  0x1f   :  { %1069 = vmatprep.mubr.msk.bf16.mxu0 %vm148_vm0, %v97_v30  ;;  %1101 = vmatprep.mubr.msk.bf16.mxu1 %vm148_vm0, %v113_v31  ;;  %v86_v11 = vld [vmem:[#allocation2 + $0x1c8] sm:$0xff]  ;;  %v120_v13 = vpack.c.bf16 %v84_v7, %v83_v6  ;;  %v105_v14 = vpack.c.bf16 %v54_v9, %v53_v8  ;;  %v55_v16 = vld [vmem:[#allocation2 + $0xd0] sm:$0xff]  ;;  %v56_v17 = vld [vmem:[#allocation2 + $0xd8] sm:$0xff] }
  0x20   :  { %v121_v15 = vpack.c.bf16 %v86_v11, %v85_v10  ;;  %v87_v18 = vld [vmem:[#allocation2 + $0x1d0] sm:$0xff]  ;;  %v88_v19 = vld [vmem:[#allocation2 + $0x1d8] sm:$0xff]  ;;  %v57_v20 = vld [vmem:[#allocation2 + $0xe0] sm:$0xff]  ;;  %v106_v24 = vpack.c.bf16 %v56_v17, %v55_v16 }
  0x21   :  { %v58_v21 = vld [vmem:[#allocation2 + $0xe8] sm:$0xff]  ;;  %v89_v22 = vld [vmem:[#allocation2 + $0x1e0] sm:$0xff]  ;;  %v122_v25 = vpack.c.bf16 %v88_v19, %v87_v18  ;;  %v59_v28 = vld [vmem:[#allocation2 + $0xf0] sm:$0xff] }
  0x22   :  { %v90_v23 = vld [vmem:[#allocation2 + $0x1e8] sm:$0xff]  ;;  %v107_v26 = vpack.c.bf16 %v58_v21, %v57_v20  ;;  %v60_v29 = vld [vmem:[#allocation2 + $0xf8] sm:$0xff]  ;;  %v91_v30 = vld [vmem:[#allocation2 + $0x1f0] sm:$0xff] }
  0x23   :  { %v123_v27 = vpack.c.bf16 %v90_v23, %v89_v22  ;;  %v92_v31 = vld [vmem:[#allocation2 + $0x1f8] sm:$0xff]  ;;  %v108_v32 = vpack.c.bf16 %v60_v29, %v59_v28  ;;  %v1223_v34 = vld [vmem:[%s1547_s2] ss:$0 sm:$0xff] }
  0x24   :  { %v124_v33 = vpack.c.bf16 %v92_v31, %v91_v30 }
  0x26   :  { %1070 = vmatmul.mubr.msk.bf16.gmra.mxu0 %vm148_vm0, %v98_v40  ;;  %1102 = vmatmul.mubr.msk.bf16.gmra.mxu1 %vm148_vm0, %v114_v41 }
  0x27   :  { %1073 = vmatprep.mubr.msk.bf16.mxu0 %vm148_vm0, %v99_v42  ;;  %1105 = vmatprep.mubr.msk.bf16.mxu1 %vm148_vm0, %v115_v43 }
  0x2e   :  { %1074 = vmatmul.mubr.msk.bf16.gmra.mxu0 %vm148_vm0, %v100_v52  ;;  %1106 = vmatmul.mubr.msk.bf16.gmra.mxu1 %vm148_vm0, %v116_v53 }
  0x2f   :  { %1077 = vmatprep.mubr.msk.bf16.mxu0 %vm148_vm0, %v101_v54  ;;  %1109 = vmatprep.mubr.msk.bf16.mxu1 %vm148_vm0, %v117_v55 }
  0x36   :  { %1078 = vmatmul.mubr.msk.bf16.gmra.mxu0 %vm148_vm0, %v102_v0  ;;  %1110 = vmatmul.mubr.msk.bf16.gmra.mxu1 %vm148_vm0, %v118_v1 }
  0x37   :  { %1081 = vmatprep.mubr.msk.bf16.mxu0 %vm148_vm0, %v103_v2  ;;  %1113 = vmatprep.mubr.msk.bf16.mxu1 %vm148_vm0, %v119_v3 }
  0x3e   :  { %1082 = vmatmul.mubr.msk.bf16.gmra.mxu0 %vm148_vm0, %v104_v12  ;;  %1114 = vmatmul.mubr.msk.bf16.gmra.mxu1 %vm148_vm0, %v120_v13 }
  0x3f   :  { %1085 = vmatprep.mubr.msk.bf16.mxu0 %vm148_vm0, %v105_v14  ;;  %1117 = vmatprep.mubr.msk.bf16.mxu1 %vm148_vm0, %v121_v15 }
  0x46   :  { %1086 = vmatmul.mubr.msk.bf16.gmra.mxu0 %vm148_vm0, %v106_v24  ;;  %1118 = vmatmul.mubr.msk.bf16.gmra.mxu1 %vm148_vm0, %v122_v25 }
  0x47   :  { %1089 = vmatprep.mubr.msk.bf16.mxu0 %vm148_vm0, %v107_v26  ;;  %1121 = vmatprep.mubr.msk.bf16.mxu1 %vm148_vm0, %v123_v27 }
  0x4e   :  { %1090 = vmatmul.mubr.msk.bf16.gmra.mxu0 %vm148_vm0, %v108_v32  ;;  %1122 = vmatmul.mubr.msk.bf16.gmra.mxu1 %vm148_vm0, %v124_v33 }
  0xd6   :  { %v1063_v35 = vpop.f32.mrf.mxu0  ;;  %v1095_v36 = vpop.f32.mrf.mxu1 }
  0xd7   :  { %v288_v37 = vadd.f32 %v1063_v35, %v1223_v34  ;;  %v416_v38 = vadd.f32 %v1095_v36, %v1223_v34 }
  0xd8   :  { %v279_v39 = vpop.f32.mrf.mxu0  ;;  %v407_v40 = vpop.f32.mrf.mxu1 }
  0xd9   :  { %v961_v41 = vpack.c.bf16 %v288_v37, %v288_v37  ;;  %v993_v42 = vpack.c.bf16 %v416_v38, %v416_v38  ;;  %v280_v43 = vadd.f32 %v1223_v34, %v279_v39  ;;  %v408_v44 = vadd.f32 %v1223_v34, %v407_v40 }
  0xda   :  { %v1064_v45 = vpop.f32.mrf.mxu0  ;;  %v1096_v46 = vpop.f32.mrf.mxu1 }
  0xdb   :  { %793 = vst.msk [vmem:[%s1548_s3 + $0x8] sm:$0xf] %vm790_vm1, %v961_v41  ;;  %825 = vst.msk [vmem:[%s1548_s3 + $0x88] sm:$0xf] %vm790_vm1, %v993_v42  ;;  %v959_v47 = vpack.c.bf16 %v280_v43, %v280_v43  ;;  %v991_v48 = vpack.c.bf16 %v408_v44, %v408_v44  ;;  %v291_v49 = vadd.f32 %v1064_v45, %v1223_v34 }
  0xdc   :  { %v419_v50 = vadd.f32 %v1096_v46, %v1223_v34  ;;  %v282_v51 = vpop.f32.mrf.mxu0  ;;  %v410_v52 = vpop.f32.mrf.mxu1 }
  0xdd   :  { %791 = vst.msk [vmem:[%s1548_s3] sm:$0xf] %vm790_vm1, %v959_v47  ;;  %823 = vst.msk [vmem:[%s1548_s3 + $0x80] sm:$0xf] %vm790_vm1, %v991_v48  ;;  %v962_v53 = vpack.c.bf16 %v291_v49, %v291_v49  ;;  %v283_v55 = vadd.f32 %v1223_v34, %v282_v51  ;;  %v411_v56 = vadd.f32 %v1223_v34, %v410_v52 }
  0xde   :  { %v994_v54 = vpack.c.bf16 %v419_v50, %v419_v50  ;;  %v1067_v57 = vpop.f32.mrf.mxu0  ;;  %v1099_v58 = vpop.f32.mrf.mxu1 }
  0xdf   :  { %794 = vst.msk [vmem:[%s1548_s3 + $0xc] sm:$0xf] %vm790_vm1, %v962_v53  ;;  %v960_v59 = vpack.c.bf16 %v283_v55, %v283_v55  ;;  %v992_v60 = vpack.c.bf16 %v411_v56, %v411_v56  ;;  %v304_v61 = vadd.f32 %v1067_v57, %v1223_v34  ;;  %v432_v62 = vadd.f32 %v1099_v58, %v1223_v34 }
  0xe0   :  { %826 = vst.msk [vmem:[%s1548_s3 + $0x8c] sm:$0xf] %vm790_vm1, %v994_v54  ;;  %v295_v63 = vpop.f32.mrf.mxu0  ;;  %v423_v0 = vpop.f32.mrf.mxu1 }
  0xe1   :  { %792 = vst.msk [vmem:[%s1548_s3 + $0x4] sm:$0xf] %vm790_vm1, %v960_v59  ;;  %824 = vst.msk [vmem:[%s1548_s3 + $0x84] sm:$0xf] %vm790_vm1, %v992_v60  ;;  %v965_v1 = vpack.c.bf16 %v304_v61, %v304_v61  ;;  %v997_v2 = vpack.c.bf16 %v432_v62, %v432_v62  ;;  %v296_v3 = vadd.f32 %v1223_v34, %v295_v63 }
  0xe2   :  { %v424_v4 = vadd.f32 %v1223_v34, %v423_v0  ;;  %v1068_v5 = vpop.f32.mrf.mxu0  ;;  %v1100_v6 = vpop.f32.mrf.mxu1 }
  0xe3   :  { %797 = vst.msk [vmem:[%s1548_s3 + $0x18] sm:$0xf] %vm790_vm1, %v965_v1  ;;  %829 = vst.msk [vmem:[%s1548_s3 + $0x98] sm:$0xf] %vm790_vm1, %v997_v2  ;;  %v963_v7 = vpack.c.bf16 %v296_v3, %v296_v3  ;;  %v307_v9 = vadd.f32 %v1068_v5, %v1223_v34  ;;  %v435_v10 = vadd.f32 %v1100_v6, %v1223_v34 }
  0xe4   :  { %v995_v8 = vpack.c.bf16 %v424_v4, %v424_v4  ;;  %v298_v11 = vpop.f32.mrf.mxu0  ;;  %v426_v12 = vpop.f32.mrf.mxu1 }
  0xe5   :  { %795 = vst.msk [vmem:[%s1548_s3 + $0x10] sm:$0xf] %vm790_vm1, %v963_v7  ;;  %v966_v13 = vpack.c.bf16 %v307_v9, %v307_v9  ;;  %v998_v14 = vpack.c.bf16 %v435_v10, %v435_v10  ;;  %v299_v15 = vadd.f32 %v1223_v34, %v298_v11  ;;  %v427_v16 = vadd.f32 %v1223_v34, %v426_v12 }
  0xe6   :  { %827 = vst.msk [vmem:[%s1548_s3 + $0x90] sm:$0xf] %vm790_vm1, %v995_v8  ;;  %v1071_v17 = vpop.f32.mrf.mxu0  ;;  %v1103_v18 = vpop.f32.mrf.mxu1 }
  0xe7   :  { %798 = vst.msk [vmem:[%s1548_s3 + $0x1c] sm:$0xf] %vm790_vm1, %v966_v13  ;;  %830 = vst.msk [vmem:[%s1548_s3 + $0x9c] sm:$0xf] %vm790_vm1, %v998_v14  ;;  %v964_v19 = vpack.c.bf16 %v299_v15, %v299_v15  ;;  %v996_v20 = vpack.c.bf16 %v427_v16, %v427_v16  ;;  %v320_v21 = vadd.f32 %v1071_v17, %v1223_v34 }
  0xe8   :  { %v448_v22 = vadd.f32 %v1103_v18, %v1223_v34  ;;  %v311_v23 = vpop.f32.mrf.mxu0  ;;  %v439_v24 = vpop.f32.mrf.mxu1 }
  0xe9   :  { %796 = vst.msk [vmem:[%s1548_s3 + $0x14] sm:$0xf] %vm790_vm1, %v964_v19  ;;  %828 = vst.msk [vmem:[%s1548_s3 + $0x94] sm:$0xf] %vm790_vm1, %v996_v20  ;;  %v969_v25 = vpack.c.bf16 %v320_v21, %v320_v21  ;;  %v312_v27 = vadd.f32 %v1223_v34, %v311_v23  ;;  %v440_v28 = vadd.f32 %v1223_v34, %v439_v24 }
  0xea   :  { %v1001_v26 = vpack.c.bf16 %v448_v22, %v448_v22  ;;  %v1072_v29 = vpop.f32.mrf.mxu0  ;;  %v1104_v30 = vpop.f32.mrf.mxu1 }
  0xeb   :  { %801 = vst.msk [vmem:[%s1548_s3 + $0x28] sm:$0xf] %vm790_vm1, %v969_v25  ;;  %v967_v31 = vpack.c.bf16 %v312_v27, %v312_v27  ;;  %v999_v32 = vpack.c.bf16 %v440_v28, %v440_v28  ;;  %v323_v33 = vadd.f32 %v1072_v29, %v1223_v34  ;;  %v451_v35 = vadd.f32 %v1104_v30, %v1223_v34 }
  0xec   :  { %833 = vst.msk [vmem:[%s1548_s3 + $0xa8] sm:$0xf] %vm790_vm1, %v1001_v26  ;;  %v314_v36 = vpop.f32.mrf.mxu0  ;;  %v442_v37 = vpop.f32.mrf.mxu1 }
  0xed   :  { %799 = vst.msk [vmem:[%s1548_s3 + $0x20] sm:$0xf] %vm790_vm1, %v967_v31  ;;  %831 = vst.msk [vmem:[%s1548_s3 + $0xa0] sm:$0xf] %vm790_vm1, %v999_v32  ;;  %v970_v38 = vpack.c.bf16 %v323_v33, %v323_v33  ;;  %v1002_v39 = vpack.c.bf16 %v451_v35, %v451_v35  ;;  %v315_v40 = vadd.f32 %v1223_v34, %v314_v36 }
  0xee   :  { %v443_v41 = vadd.f32 %v1223_v34, %v442_v37  ;;  %v1075_v42 = vpop.f32.mrf.mxu0  ;;  %v1107_v43 = vpop.f32.mrf.mxu1 }
  0xef   :  { %802 = vst.msk [vmem:[%s1548_s3 + $0x2c] sm:$0xf] %vm790_vm1, %v970_v38  ;;  %834 = vst.msk [vmem:[%s1548_s3 + $0xac] sm:$0xf] %vm790_vm1, %v1002_v39  ;;  %v968_v44 = vpack.c.bf16 %v315_v40, %v315_v40  ;;  %v336_v46 = vadd.f32 %v1075_v42, %v1223_v34  ;;  %v464_v47 = vadd.f32 %v1107_v43, %v1223_v34 }
  0xf0   :  { %v1000_v45 = vpack.c.bf16 %v443_v41, %v443_v41  ;;  %v327_v48 = vpop.f32.mrf.mxu0  ;;  %v455_v49 = vpop.f32.mrf.mxu1 }
  0xf1   :  { %800 = vst.msk [vmem:[%s1548_s3 + $0x24] sm:$0xf] %vm790_vm1, %v968_v44  ;;  %v973_v50 = vpack.c.bf16 %v336_v46, %v336_v46  ;;  %v1005_v51 = vpack.c.bf16 %v464_v47, %v464_v47  ;;  %v328_v52 = vadd.f32 %v1223_v34, %v327_v48  ;;  %v456_v53 = vadd.f32 %v1223_v34, %v455_v49 }
  0xf2   :  { %832 = vst.msk [vmem:[%s1548_s3 + $0xa4] sm:$0xf] %vm790_vm1, %v1000_v45  ;;  %v1076_v54 = vpop.f32.mrf.mxu0  ;;  %v1108_v55 = vpop.f32.mrf.mxu1 }
  0xf3   :  { %805 = vst.msk [vmem:[%s1548_s3 + $0x38] sm:$0xf] %vm790_vm1, %v973_v50  ;;  %837 = vst.msk [vmem:[%s1548_s3 + $0xb8] sm:$0xf] %vm790_vm1, %v1005_v51  ;;  %v971_v56 = vpack.c.bf16 %v328_v52, %v328_v52  ;;  %v1003_v57 = vpack.c.bf16 %v456_v53, %v456_v53  ;;  %v339_v58 = vadd.f32 %v1076_v54, %v1223_v34 }
  0xf4   :  { %v467_v59 = vadd.f32 %v1108_v55, %v1223_v34  ;;  %v330_v60 = vpop.f32.mrf.mxu0  ;;  %v458_v61 = vpop.f32.mrf.mxu1 }
  0xf5   :  { %803 = vst.msk [vmem:[%s1548_s3 + $0x30] sm:$0xf] %vm790_vm1, %v971_v56  ;;  %835 = vst.msk [vmem:[%s1548_s3 + $0xb0] sm:$0xf] %vm790_vm1, %v1003_v57  ;;  %v974_v62 = vpack.c.bf16 %v339_v58, %v339_v58  ;;  %v331_v0 = vadd.f32 %v1223_v34, %v330_v60  ;;  %v459_v1 = vadd.f32 %v1223_v34, %v458_v61 }
  0xf6   :  { %v1006_v63 = vpack.c.bf16 %v467_v59, %v467_v59  ;;  %v1079_v2 = vpop.f32.mrf.mxu0  ;;  %v1111_v3 = vpop.f32.mrf.mxu1 }
  0xf7   :  { %806 = vst.msk [vmem:[%s1548_s3 + $0x3c] sm:$0xf] %vm790_vm1, %v974_v62  ;;  %v972_v4 = vpack.c.bf16 %v331_v0, %v331_v0  ;;  %v1004_v5 = vpack.c.bf16 %v459_v1, %v459_v1  ;;  %v352_v6 = vadd.f32 %v1079_v2, %v1223_v34  ;;  %v480_v7 = vadd.f32 %v1111_v3, %v1223_v34 }
  0xf8   :  { %838 = vst.msk [vmem:[%s1548_s3 + $0xbc] sm:$0xf] %vm790_vm1, %v1006_v63  ;;  %v343_v8 = vpop.f32.mrf.mxu0  ;;  %v471_v9 = vpop.f32.mrf.mxu1 }
  0xf9   :  { %804 = vst.msk [vmem:[%s1548_s3 + $0x34] sm:$0xf] %vm790_vm1, %v972_v4  ;;  %836 = vst.msk [vmem:[%s1548_s3 + $0xb4] sm:$0xf] %vm790_vm1, %v1004_v5  ;;  %v977_v10 = vpack.c.bf16 %v352_v6, %v352_v6  ;;  %v1009_v11 = vpack.c.bf16 %v480_v7, %v480_v7  ;;  %v344_v12 = vadd.f32 %v1223_v34, %v343_v8 }
  0xfa   :  { %v472_v13 = vadd.f32 %v1223_v34, %v471_v9  ;;  %v1080_v14 = vpop.f32.mrf.mxu0  ;;  %v1112_v15 = vpop.f32.mrf.mxu1 }
  0xfb   :  { %809 = vst.msk [vmem:[%s1548_s3 + $0x48] sm:$0xf] %vm790_vm1, %v977_v10  ;;  %841 = vst.msk [vmem:[%s1548_s3 + $0xc8] sm:$0xf] %vm790_vm1, %v1009_v11  ;;  %v975_v16 = vpack.c.bf16 %v344_v12, %v344_v12  ;;  %v355_v18 = vadd.f32 %v1080_v14, %v1223_v34  ;;  %v483_v19 = vadd.f32 %v1112_v15, %v1223_v34 }
  0xfc   :  { %v1007_v17 = vpack.c.bf16 %v472_v13, %v472_v13  ;;  %v346_v20 = vpop.f32.mrf.mxu0  ;;  %v474_v21 = vpop.f32.mrf.mxu1 }
  0xfd   :  { %807 = vst.msk [vmem:[%s1548_s3 + $0x40] sm:$0xf] %vm790_vm1, %v975_v16  ;;  %v978_v22 = vpack.c.bf16 %v355_v18, %v355_v18  ;;  %v1010_v23 = vpack.c.bf16 %v483_v19, %v483_v19  ;;  %v347_v24 = vadd.f32 %v1223_v34, %v346_v20  ;;  %v475_v25 = vadd.f32 %v1223_v34, %v474_v21 }
  0xfe   :  { %839 = vst.msk [vmem:[%s1548_s3 + $0xc0] sm:$0xf] %vm790_vm1, %v1007_v17  ;;  %v1083_v26 = vpop.f32.mrf.mxu0  ;;  %v1115_v27 = vpop.f32.mrf.mxu1 }
  0xff   :  { %810 = vst.msk [vmem:[%s1548_s3 + $0x4c] sm:$0xf] %vm790_vm1, %v978_v22  ;;  %842 = vst.msk [vmem:[%s1548_s3 + $0xcc] sm:$0xf] %vm790_vm1, %v1010_v23  ;;  %v976_v28 = vpack.c.bf16 %v347_v24, %v347_v24  ;;  %v1008_v29 = vpack.c.bf16 %v475_v25, %v475_v25  ;;  %v368_v30 = vadd.f32 %v1083_v26, %v1223_v34 }
 0x100   :  { %v496_v31 = vadd.f32 %v1115_v27, %v1223_v34  ;;  %v359_v32 = vpop.f32.mrf.mxu0  ;;  %v487_v33 = vpop.f32.mrf.mxu1 }
 0x101   :  { %808 = vst.msk [vmem:[%s1548_s3 + $0x44] sm:$0xf] %vm790_vm1, %v976_v28  ;;  %840 = vst.msk [vmem:[%s1548_s3 + $0xc4] sm:$0xf] %vm790_vm1, %v1008_v29  ;;  %v981_v35 = vpack.c.bf16 %v368_v30, %v368_v30  ;;  %v360_v37 = vadd.f32 %v1223_v34, %v359_v32  ;;  %v488_v38 = vadd.f32 %v1223_v34, %v487_v33 }
 0x102   :  { %v1013_v36 = vpack.c.bf16 %v496_v31, %v496_v31  ;;  %v1084_v39 = vpop.f32.mrf.mxu0  ;;  %v1116_v40 = vpop.f32.mrf.mxu1 }
 0x103   :  { %813 = vst.msk [vmem:[%s1548_s3 + $0x58] sm:$0xf] %vm790_vm1, %v981_v35  ;;  %v979_v41 = vpack.c.bf16 %v360_v37, %v360_v37  ;;  %v1011_v42 = vpack.c.bf16 %v488_v38, %v488_v38  ;;  %v371_v43 = vadd.f32 %v1084_v39, %v1223_v34  ;;  %v499_v44 = vadd.f32 %v1116_v40, %v1223_v34 }
 0x104   :  { %845 = vst.msk [vmem:[%s1548_s3 + $0xd8] sm:$0xf] %vm790_vm1, %v1013_v36  ;;  %v362_v45 = vpop.f32.mrf.mxu0  ;;  %v490_v46 = vpop.f32.mrf.mxu1 }
 0x105   :  { %811 = vst.msk [vmem:[%s1548_s3 + $0x50] sm:$0xf] %vm790_vm1, %v979_v41  ;;  %843 = vst.msk [vmem:[%s1548_s3 + $0xd0] sm:$0xf] %vm790_vm1, %v1011_v42  ;;  %v982_v47 = vpack.c.bf16 %v371_v43, %v371_v43  ;;  %v1014_v48 = vpack.c.bf16 %v499_v44, %v499_v44  ;;  %v363_v49 = vadd.f32 %v1223_v34, %v362_v45 }
 0x106   :  { %v491_v50 = vadd.f32 %v1223_v34, %v490_v46  ;;  %v1087_v51 = vpop.f32.mrf.mxu0  ;;  %v1119_v52 = vpop.f32.mrf.mxu1 }
 0x107   :  { %814 = vst.msk [vmem:[%s1548_s3 + $0x5c] sm:$0xf] %vm790_vm1, %v982_v47  ;;  %846 = vst.msk [vmem:[%s1548_s3 + $0xdc] sm:$0xf] %vm790_vm1, %v1014_v48  ;;  %v980_v53 = vpack.c.bf16 %v363_v49, %v363_v49  ;;  %v384_v55 = vadd.f32 %v1087_v51, %v1223_v34  ;;  %v512_v56 = vadd.f32 %v1119_v52, %v1223_v34 }
 0x108   :  { %v1012_v54 = vpack.c.bf16 %v491_v50, %v491_v50  ;;  %v375_v57 = vpop.f32.mrf.mxu0  ;;  %v503_v58 = vpop.f32.mrf.mxu1 }
 0x109   :  { %812 = vst.msk [vmem:[%s1548_s3 + $0x54] sm:$0xf] %vm790_vm1, %v980_v53  ;;  %v985_v59 = vpack.c.bf16 %v384_v55, %v384_v55  ;;  %v1017_v60 = vpack.c.bf16 %v512_v56, %v512_v56  ;;  %v376_v61 = vadd.f32 %v1223_v34, %v375_v57  ;;  %v504_v62 = vadd.f32 %v1223_v34, %v503_v58 }
 0x10a   :  { %844 = vst.msk [vmem:[%s1548_s3 + $0xd4] sm:$0xf] %vm790_vm1, %v1012_v54  ;;  %v1088_v63 = vpop.f32.mrf.mxu0  ;;  %v1120_v0 = vpop.f32.mrf.mxu1 }
 0x10b   :  { %817 = vst.msk [vmem:[%s1548_s3 + $0x68] sm:$0xf] %vm790_vm1, %v985_v59  ;;  %849 = vst.msk [vmem:[%s1548_s3 + $0xe8] sm:$0xf] %vm790_vm1, %v1017_v60  ;;  %v983_v1 = vpack.c.bf16 %v376_v61, %v376_v61  ;;  %v1015_v2 = vpack.c.bf16 %v504_v62, %v504_v62  ;;  %v387_v3 = vadd.f32 %v1088_v63, %v1223_v34 }
 0x10c   :  { %v515_v4 = vadd.f32 %v1120_v0, %v1223_v34  ;;  %v378_v5 = vpop.f32.mrf.mxu0  ;;  %v506_v6 = vpop.f32.mrf.mxu1 }
 0x10d   :  { %815 = vst.msk [vmem:[%s1548_s3 + $0x60] sm:$0xf] %vm790_vm1, %v983_v1  ;;  %847 = vst.msk [vmem:[%s1548_s3 + $0xe0] sm:$0xf] %vm790_vm1, %v1015_v2  ;;  %v986_v7 = vpack.c.bf16 %v387_v3, %v387_v3  ;;  %v379_v9 = vadd.f32 %v1223_v34, %v378_v5  ;;  %v507_v10 = vadd.f32 %v1223_v34, %v506_v6 }
 0x10e   :  { %v1018_v8 = vpack.c.bf16 %v515_v4, %v515_v4  ;;  %v1091_v11 = vpop.f32.mrf.mxu0  ;;  %v1123_v12 = vpop.f32.mrf.mxu1 }
 0x10f   :  { %818 = vst.msk [vmem:[%s1548_s3 + $0x6c] sm:$0xf] %vm790_vm1, %v986_v7  ;;  %v984_v13 = vpack.c.bf16 %v379_v9, %v379_v9  ;;  %v1016_v14 = vpack.c.bf16 %v507_v10, %v507_v10  ;;  %v400_v15 = vadd.f32 %v1091_v11, %v1223_v34  ;;  %v528_v16 = vadd.f32 %v1123_v12, %v1223_v34 }
 0x110   :  { %850 = vst.msk [vmem:[%s1548_s3 + $0xec] sm:$0xf] %vm790_vm1, %v1018_v8  ;;  %v391_v17 = vpop.f32.mrf.mxu0  ;;  %v519_v18 = vpop.f32.mrf.mxu1 }
 0x111   :  { %816 = vst.msk [vmem:[%s1548_s3 + $0x64] sm:$0xf] %vm790_vm1, %v984_v13  ;;  %848 = vst.msk [vmem:[%s1548_s3 + $0xe4] sm:$0xf] %vm790_vm1, %v1016_v14  ;;  %v989_v19 = vpack.c.bf16 %v400_v15, %v400_v15  ;;  %v1021_v20 = vpack.c.bf16 %v528_v16, %v528_v16  ;;  %v392_v21 = vadd.f32 %v1223_v34, %v391_v17 }
 0x112   :  { %v520_v22 = vadd.f32 %v1223_v34, %v519_v18  ;;  %v1092_v23 = vpop.f32.mrf.mxu0  ;;  %v1124_v24 = vpop.f32.mrf.mxu1 }
 0x113   :  { %821 = vst.msk [vmem:[%s1548_s3 + $0x78] sm:$0xf] %vm790_vm1, %v989_v19  ;;  %853 = vst.msk [vmem:[%s1548_s3 + $0xf8] sm:$0xf] %vm790_vm1, %v1021_v20  ;;  %v987_v25 = vpack.c.bf16 %v392_v21, %v392_v21  ;;  %v403_v27 = vadd.f32 %v1092_v23, %v1223_v34  ;;  %v531_v28 = vadd.f32 %v1124_v24, %v1223_v34 }
 0x114   :  { %v1019_v26 = vpack.c.bf16 %v520_v22, %v520_v22  ;;  %v394_v29 = vpop.f32.mrf.mxu0  ;;  %v522_v30 = vpop.f32.mrf.mxu1 }
 0x115   :  { %819 = vst.msk [vmem:[%s1548_s3 + $0x70] sm:$0xf] %vm790_vm1, %v987_v25  ;;  %v990_v31 = vpack.c.bf16 %v403_v27, %v403_v27  ;;  %v1022_v32 = vpack.c.bf16 %v531_v28, %v531_v28  ;;  %v395_v33 = vadd.f32 %v1223_v34, %v394_v29  ;;  %v523_v35 = vadd.f32 %v1223_v34, %v522_v30 }
 0x116   :  { %851 = vst.msk [vmem:[%s1548_s3 + $0xf0] sm:$0xf] %vm790_vm1, %v1019_v26 }
 0x117   :  { %822 = vst.msk [vmem:[%s1548_s3 + $0x7c] sm:$0xf] %vm790_vm1, %v990_v31  ;;  %854 = vst.msk [vmem:[%s1548_s3 + $0xfc] sm:$0xf] %vm790_vm1, %v1022_v32  ;;  %v988_v36 = vpack.c.bf16 %v395_v33, %v395_v33  ;;  %v1020_v37 = vpack.c.bf16 %v523_v35, %v523_v35 }
 0x119   :  { %820 = vst.msk [vmem:[%s1548_s3 + $0x74] sm:$0xf] %vm790_vm1, %v988_v36  ;;  %852 = vst.msk [vmem:[%s1548_s3 + $0xf4] sm:$0xf] %vm790_vm1, %v1020_v37 }
 0x11a   :  { %859 = vsyncpa [#allocation3], 1 }

// kernel: self_attention_forward.3
= control target key start
LH: loop header
LB: loop body
LE: loop exit
PB: predicated region body
PF: predicated region fallthrough
CT: control target
= control target key end

     0   :  { %s2317_s0 = inlined_call_operand.<no memory space> [shape: f32[1], index: 0, kind: input, shape index: {}]   ;;  %s2318_s1 = inlined_call_operand.vmem [shape: bf16[2,256,4], index: 1, kind: input, shape index: {}]   ;;  %s2319_s2 = inlined_call_operand.vmem [shape: bf16[2,256,4], index: 2, kind: input, shape index: {}]   ;;  %s2320_s3 = inlined_call_operand.vmem [shape: bf16[2,256,32], index: 3, kind: input, shape index: {}]   ;;  %s2321_s4 = inlined_call_operand.vmem [shape: f32[2,256,32], index: 4, kind: input, shape index: {}]   ;;  %s2322_s5 = inlined_call_operand.hbm [shape: f32[2,256,32], index: 5, kind: output, shape index: {}]  }
   0x1   :  { %10 = sst [smem:[#allocation2]] %s2317_s0 }
   0x2   :  { %11 = vsyncpa [#allocation4], 0 }
   0x3   :  { %13 = vsyncpa [#allocation4 + $0x1], 0  ;;  %s1873_s20 = smov 0   ;;  %s1875_s21 = smov 0  }
   0x4   :  { %s1877_s22 = smov 0   ;;  %s1879_s23 = smov 0  }
   0x5   :  { %s1881_s24 = smov 0   ;;  %s1883_s25 = smov 0  }
   0x6   :  { %s1885_s26 = smov 0   ;;  %s1887_s27 = smov 0  }
   0x7 LB: > { %s1358_s0 = sadd.s32 4294967295, %s1835_s27   ;;  %s1359_s28 = sadd.s32 4294967294, %s1835_s27   ;;  %s1835_s27 = sphi %s1887_s27, %s19_s27   ;;  %s1831_s26 = sphi %s1885_s26, %s2331_s26   ;;  %s1827_s25 = sphi %s1883_s25, %s2330_s25   ;;  %s1823_s24 = sphi %s1881_s24, %s2329_s24   ;;  %s1819_s23 = sphi %s1879_s23, %s2328_s23   ;;  %s1815_s22 = sphi %s1877_s22, %s2327_s22   ;;  %s1811_s21 = sphi %s1875_s21, %s2326_s21   ;;  %s1807_s20 = sphi %s1873_s20, %s2325_s20  }
   0x8   : > { %s28_s29 = sadd.s32 1, %s1827_s25  ;;  %s31_s30 = sadd.s32 1, %s1831_s26 }
   0x9   : > { %p29_p0 = scmp.ge.s32.totalorder %s28_s29, 2  ;;  %p179_p1 = scmp.ne.s32.totalorder %s1815_s22, %s1811_s21 }
   0xa   : > { %p180_p2 = scmp.eq.s32.totalorder %s1358_s0, 3  ;;  %p185_p5 = scmp.ne.s32.totalorder %s1811_s21, %s1807_s20 }
   0xb   : > { %s2333_s29 = smov (%p29_p0, %s28_s29), 0  ;;  %s2335_s30 = smov (!%p29_p0, %s31_s30), %s1831_s26 }
   0xc   : > { %s165_s6 = ssub.s32 %s1827_s25, %s2333_s29  ;;  %p1924_p3 = por %p180_p2, %p179_p1 }
   0xd   : > { %p33_p4 = scmp.ge.s32.totalorder %s2335_s30, 2  ;;  %p186_p6 = scmp.eq.s32.totalorder %s1359_s28, 3 }
   0xe   : > { %p1362_p7 = scmp.ge.s32.totalorder %s1835_s27, 1  ;;  %p249_p9 = scmp.lt.s32.totalorder %s1835_s27, 5 }
   0xf   : > { %s2337_s30 = smov (%p33_p4, %s2335_s30), 0  ;;  %p1933_p8 = por %p186_p6, %p185_p5 }
  0x10   : > { %s164_s9 = ssub.s32 %s1831_s26, %s2337_s30  ;;  %s169_s10 = sadd.s32 1, %s1815_s22 }
  0x11   : > { %s166_s11 = sor.u32 %s165_s6, %s164_s9  ;;  %p250_p10 = pnand %p1362_p7, %p249_p9 }
  0x12   : > { %p167_p11 = scmp.eq.s32.totalorder %s166_s11, 0  ;;  %p301_p12 = scmp.lt.s32.totalorder (!%p250_p10), %s1823_s24, 1 }
  0x13   : > { %253 = sbr.rel (%p250_p10) target bundleno = 732 (0x2dc), region = 40  ;;  %s1946_s13 = sshll.u32 (!%p250_p10), %s1819_s23, 4 }
  0x14   : > { %s1942_s12 = scalar_select %p167_p11, %s1815_s22, %s169_s10  }
  0x15   : > { %p303_p13 = scmp.lt.s32.totalorder (!%p250_p10), %s1946_s13, 31  ;;  %s1424_s9 = sshll.u32 (!%p250_p10), %s1823_s24, 5 }
  0x18   : > { %s1949_s14 = scalar_select %p301_p12, %s1823_s24, 1  ;;  %vm500_vm0 = vcmask 31744   ;;  %vm1201_vm1 = vcmask 261120  }
  0x19   : > { %s304_s19 = scalar_select %p303_p13, %s1946_s13, 31 }
  0x1a   : > { %s1428_s15 = sshll.u32 %s1949_s14, 7  ;;  %s1365_s23 = sshll.u32 %s1949_s14, 5 }
  0x1b   : > { %s1957_s18 = scalar_lea.vmem %s2319_s2, %s1428_s15  ;;  %s1969_s0 = sadd.s32 %s1365_s23, %s304_s19 }
  0x1c   : > { %v1607_v0 = vld [vmem:[%s1957_s18 + $0x78] sm:$0xff]   ;;  %v1609_v2 = vld [vmem:[%s1957_s18 + $0x70] sm:$0xff]   ;;  %v1611_v6 = vld [vmem:[%s1957_s18 + $0x68] sm:$0xff]   ;;  %s1366_s28 = sshll.u32 %s1969_s0, 2  ;;  %s2031_s17 = scalar_lea.vmem %s2320_s3, %s1428_s15 }
  0x1d   : > { %v1608_v1 = vld [vmem:[%s1957_s18 + $0x38] sm:$0xff]   ;;  %1526 = vmatprep.subr.msk.bf16.mxu0 %vm500_vm0, %v1607_v0  ;;  %v1610_v4 = vld [vmem:[%s1957_s18 + $0x30] sm:$0xff]   ;;  %v1612_v7 = vld [vmem:[%s1957_s18 + $0x28] sm:$0xff]   ;;  %s1979_s10 = scalar_lea.vmem %s2318_s1, %s1366_s28  ;;  %s1151_s14 = sld [smem:[#allocation2]] }
  0x1e   : > { %v547_v3 = vsel %vm500_vm0, %v1608_v1, 0  ;;  %v544_v5 = vsel %vm500_vm0, %v1610_v4, 0  ;;  %v1623_v8 = vld [vmem:[%s1979_s10] sm:$0xff]   ;;  %v541_v9 = vsel %vm500_vm0, %v1612_v7, 0  ;;  %v1615_v13 = vld [vmem:[%s1957_s18 + $0x58] sm:$0xff]   ;;  %v1617_v16 = vld [vmem:[%s1957_s18 + $0x50] sm:$0xff]  }
  0x1f   : > { %1431 = vmatpush3.bf16.xpose.msra.mxu0 %v547_v3  ;;  %v1613_v10 = vld [vmem:[%s1957_s18 + $0x60] sm:$0xff]   ;;  %1446 = vmatprep.mubr.msk.bf16.mxu0 %vm500_vm0, %v1623_v8  ;;  %v1616_v14 = vld [vmem:[%s1957_s18 + $0x18] sm:$0xff]   ;;  %v1618_v17 = vld [vmem:[%s1957_s18 + $0x10] sm:$0xff]   ;;  %s1373_s15 = sshll.u32 %s1969_s0, 3  ;;  %s1837_s19 = smov [#allocation3]  }
  0x20   : > { %1527 = vmatprep.subr.msk.bf16.mxu0 %vm500_vm0, %v1609_v2  ;;  %v1614_v11 = vld [vmem:[%s1957_s18 + $0x20] sm:$0xff]   ;;  %v535_v15 = vsel %vm500_vm0, %v1616_v14, 0  ;;  %v532_v18 = vsel %vm500_vm0, %v1618_v17, 0  ;;  %v1619_v19 = vld [vmem:[%s1957_s18 + $0x48] sm:$0xff]   ;;  %v1625_v26 = vld [vmem:[%s1979_s10 + $0x10] sm:$0xff]   ;;  %s2182_s28 = scalar_lea.vmem %s2321_s4, %s1373_s15  ;;  %s1747_s23 = sshll.u32 %s1837_s19, 4  ;;  %s1748_s23 = int_to_ptr.vmem [resolvable:$false] %s1747_s23 }
  0x21   : > { %v538_v12 = vsel %vm500_vm0, %v1614_v11, 0  ;;  %v1620_v20 = vld [vmem:[%s1957_s18 + $0x8] sm:$0xff]   ;;  %v1621_v22 = vld [vmem:[%s1957_s18 + $0x40] sm:$0xff]   ;;  %v1626_v27 = vld [vmem:[%s1979_s10 + $0x18] sm:$0xff]  }
  0x22   : > { %v529_v21 = vsel %vm500_vm0, %v1620_v20, 0  ;;  %v1622_v23 = vld [vmem:[%s1957_s18] sm:$0xff]   ;;  %v1624_v25 = vld [vmem:[%s1979_s10 + $0x8] sm:$0xff]   ;;  %v1629_v30 = vld [vmem:[%s1979_s10 + $0x30] sm:$0xff]   ;;  %s297_s18 = sand.u32 1, %s1811_s21  }
  0x23   : > { %v526_v24 = vsel %vm500_vm0, %v1622_v23, 0  ;;  %v1627_v28 = vld [vmem:[%s1979_s10 + $0x20] sm:$0xff]   ;;  %v1628_v29 = vld [vmem:[%s1979_s10 + $0x28] sm:$0xff]   ;;  %v1630_v31 = vld [vmem:[%s1979_s10 + $0x38] sm:$0xff]   ;;  %s1363_s0 = sshll.u32 %s297_s18, 7  ;;  %s1231_s10 = sadd.s32 %s1424_s9, %s1946_s13 }
  0x24   : > { %v1631_v32 = vld [vmem:[%s2031_s17 + $0x78] sm:$0xff]   ;;  %v1633_v34 = vld [vmem:[%s2031_s17 + $0x70] sm:$0xff]   ;;  %v1635_v48 = vld [vmem:[%s2031_s17 + $0x68] sm:$0xff]   ;;  %s2191_s6 = scalar_lea.vmem [#allocation3], %s1363_s0  ;;  %s1425_s24 = sshll.u32 %s1231_s10, 7 }
  0x25   : > { %v1632_v33 = vld [vmem:[%s2031_s17 + $0x38] sm:$0xff]   ;;  %1462 = vmatprep.subr.bf16.mxu1 %v1631_v32  ;;  %v1634_v35 = vld [vmem:[%s2031_s17 + $0x30] sm:$0xff]   ;;  %v1636_v50 = vld [vmem:[%s2031_s17 + $0x28] sm:$0xff]   ;;  %s1234_s11 = sshll.u32 %s2191_s6, 4  ;;  %s2260_s11 = int_to_ptr.vmem [resolvable:$true] %s1234_s11 }
  0x26   : > { %1463 = vmatpush3.bf16.msra.mxu1 %v1632_v33  ;;  %v1637_v53 = vld [vmem:[%s2031_s17 + $0x60] sm:$0xff]   ;;  %v1639_v58 = vld [vmem:[%s2031_s17 + $0x58] sm:$0xff]   ;;  %v1641_v63 = vld [vmem:[%s2031_s17 + $0x50] sm:$0xff]   ;;  %s1743_s15 = scalar_lea.vmem %s2260_s11, 2048  ;;  %p1750_p4 = scmp.lt.s32.totalorder %s2260_s11, %s1748_s23 }
  0x27   : > { %1433 = vmatpush3.bf16.xpose.msra.mxu0 %v544_v5  ;;  %1464 = vmatprep.subr.bf16.mxu1 %v1633_v34  ;;  %v1638_v55 = vld [vmem:[%s2031_s17 + $0x20] sm:$0xff]   ;;  %v1640_v60 = vld [vmem:[%s2031_s17 + $0x18] sm:$0xff]   ;;  %v1642_v1 = vld [vmem:[%s2031_s17 + $0x10] sm:$0xff]   ;;  %p1744_p0 = scmp.ne.s32.totalorder %s2260_s11, %s1743_s15 }
  0x28   : > { %1528 = vmatprep.subr.msk.bf16.mxu0 %vm500_vm0, %v1611_v6  ;;  %v1643_v4 = vld [vmem:[%s2031_s17 + $0x48] sm:$0xff]   ;;  %v1646_v11 = vld [vmem:[%s2031_s17] sm:$0xff]  }
  0x29   : > { %v1644_v6 = vld [vmem:[%s2031_s17 + $0x8] sm:$0xff]   ;;  %p1745_p1 = pnand %p1744_p0, %p1924_p3 }
  0x2a   : > { %1465 = vmatpush3.bf16.msra.mxu1 %v1634_v35 }
  0x2b   : > { %1466 = vmatprep.subr.bf16.mxu1 %v1635_v48  ;;  %p1746_p2 = pneg %p1745_p1 }
  0x2e   : > { %1467 = vmatpush3.bf16.msra.mxu1 %v1636_v50 }
  0x2f   : > { %1435 = vmatpush3.bf16.xpose.msra.mxu0 %v541_v9  ;;  %1468 = vmatprep.subr.bf16.mxu1 %v1637_v53  ;;  %v1645_v9 = vld [vmem:[%s2031_s17 + $0x40] sm:$0xff]   ;;  %s2255_s17 = scalar_lea.hbm %s2322_s5, %s1425_s24 }
  0x30   : > { %1529 = vmatprep.subr.msk.bf16.mxu0 %vm500_vm0, %v1613_v10 }
  0x32   : > { %1469 = vmatpush3.bf16.msra.mxu1 %v1638_v55 }
  0x33   : > { %1470 = vmatprep.subr.bf16.mxu1 %v1639_v58 }
  0x36   : > { %1471 = vmatpush3.bf16.msra.mxu1 %v1640_v60 }
  0x37   : > { %1437 = vmatpush3.bf16.xpose.msra.mxu0 %v538_v12  ;;  %1472 = vmatprep.subr.bf16.mxu1 %v1641_v63 }
  0x38   : > { %1530 = vmatprep.subr.msk.bf16.mxu0 %vm500_vm0, %v1615_v13 }
  0x3a   : > { %1473 = vmatpush3.bf16.msra.mxu1 %v1642_v1 }
  0x3b   : > { %1474 = vmatprep.subr.bf16.mxu1 %v1643_v4 }
  0x3e   : > { %1475 = vmatpush3.bf16.msra.mxu1 %v1644_v6 }
  0x3f   : > { %1439 = vmatpush3.bf16.xpose.msra.mxu0 %v535_v15  ;;  %1476 = vmatprep.subr.bf16.mxu1 %v1645_v9 }
  0x40   : > { %1531 = vmatprep.subr.msk.bf16.mxu0 %vm500_vm0, %v1617_v16 }
  0x42   : > { %1477 = vmatpush3.bf16.msra.mxu1 %v1646_v11 }
  0x47   : > { %1441 = vmatpush3.bf16.xpose.msra.mxu0 %v532_v18 }
  0x48   : > { %1532 = vmatprep.subr.msk.bf16.mxu0 %vm500_vm0, %v1619_v19 }
  0x4f   : > { %1443 = vmatpush3.bf16.xpose.msra.mxu0 %v529_v21 }
  0x50   : > { %1533 = vmatprep.subr.msk.bf16.mxu0 %vm500_vm0, %v1621_v22 }
  0x57   : > { %1445 = vmatpush3.bf16.xpose.msra.mxu0 %v526_v24 }
  0x5e   : > { %1447 = vmatmul.mubr.msk.bf16.vlgmr.msra.gmra.mxu0 %vm500_vm0, %v1623_v8 }
  0x5f   : > { %1448 = vmatprep.mubr.msk.bf16.mxu0 %vm500_vm0, %v1624_v25 }
  0x66   : > { %1449 = vmatmul.mubr.msk.bf16.gmra.mxu0 %vm500_vm0, %v1624_v25 }
  0x67   : > { %1450 = vmatprep.mubr.msk.bf16.mxu0 %vm500_vm0, %v1625_v26 }
  0x6e   : > { %1451 = vmatmul.mubr.msk.bf16.gmra.mxu0 %vm500_vm0, %v1625_v26 }
  0x6f   : > { %1452 = vmatprep.mubr.msk.bf16.mxu0 %vm500_vm0, %v1626_v27 }
  0x76   : > { %1453 = vmatmul.mubr.msk.bf16.gmra.mxu0 %vm500_vm0, %v1626_v27 }
  0x77   : > { %1454 = vmatprep.mubr.msk.bf16.mxu0 %vm500_vm0, %v1627_v28 }
  0x7e   : > { %1455 = vmatmul.mubr.msk.bf16.gmra.mxu0 %vm500_vm0, %v1627_v28 }
  0x7f   : > { %1456 = vmatprep.mubr.msk.bf16.mxu0 %vm500_vm0, %v1628_v29 }
  0x86   : > { %1457 = vmatmul.mubr.msk.bf16.gmra.mxu0 %vm500_vm0, %v1628_v29 }
  0x87   : > { %1458 = vmatprep.mubr.msk.bf16.mxu0 %vm500_vm0, %v1629_v30 }
  0x8e   : > { %1459 = vmatmul.mubr.msk.bf16.gmra.mxu0 %vm500_vm0, %v1629_v30 }
  0x8f   : > { %1460 = vmatprep.mubr.msk.bf16.mxu0 %vm500_vm0, %v1630_v31 }
  0x96   : > { %1461 = vmatmul.mubr.msk.bf16.gmra.mxu0 %vm500_vm0, %v1630_v31 }
 0x11e   : > { %v2037_v36 = vpop.f32.mrf.mxu0 }
 0x120   : > { %v2039_v37 = vpop.f32.mrf.mxu0 }
 0x121   : > { %v686_v38 = vmax.f32 %v2037_v36, %v2039_v37 }
 0x122   : > { %v2043_v39 = vpop.f32.mrf.mxu0 }
 0x123   : > { %687 = vmax.xlane.f32.xlu0 %v686_v38 }
 0x124   : > { %v2045_v40 = vpop.f32.mrf.mxu0 }
 0x125   : > { %v689_v41 = vmax.f32 %v2043_v39, %v2045_v40 }
 0x126   : > { %v2049_v42 = vpop.f32.mrf.mxu0 }
 0x127   : > { %690 = vmax.xlane.f32.xlu0 %v689_v41 }
 0x128   : > { %v2051_v43 = vpop.f32.mrf.mxu0 }
 0x129   : > { %v692_v44 = vmax.f32 %v2049_v42, %v2051_v43 }
 0x12a   : > { %v2055_v45 = vpop.f32.mrf.mxu0 }
 0x12b   : > { %693 = vmax.xlane.f32.xlu1 %v692_v44 }
 0x12c   : > { %v2057_v46 = vpop.f32.mrf.mxu0 }
 0x12d   : > { %v695_v47 = vmax.f32 %v2055_v45, %v2057_v46 }
 0x12e   : > { %v2062_v49 = vpop.f32.mrf.mxu0 }
 0x12f   : > { %696 = vmax.xlane.f32.xlu1 %v695_v47 }
 0x130   : > { %v2065_v51 = vpop.f32.mrf.mxu0 }
 0x131   : > { %v698_v52 = vmax.f32 %v2062_v49, %v2065_v51 }
 0x132   : > { %v2070_v54 = vpop.f32.mrf.mxu0 }
 0x133   : > { %699 = vmax.xlane.f32.xlu0 %v698_v52 }
 0x134   : > { %v2073_v56 = vpop.f32.mrf.mxu0 }
 0x135   : > { %v701_v57 = vmax.f32 %v2070_v54, %v2073_v56 }
 0x136   : > { %v2078_v59 = vpop.f32.mrf.mxu0 }
 0x137   : > { %702 = vmax.xlane.f32.xlu1 %v701_v57 }
 0x138   : > { %v2081_v61 = vpop.f32.mrf.mxu0 }
 0x139   : > { %v704_v62 = vmax.f32 %v2078_v59, %v2081_v61 }
 0x13a   : > { %v2086_v0 = vpop.f32.mrf.mxu0 }
 0x13b   : > { %705 = vmax.xlane.f32.xlu0 %v704_v62 }
 0x13c   : > { %v2089_v2 = vpop.f32.mrf.mxu0 }
 0x13d   : > { %v707_v3 = vmax.f32 %v2086_v0, %v2089_v2 }
 0x13e   : > { %v2094_v5 = vpop.f32.mrf.mxu0 }
 0x13f   : > { %708 = vmax.xlane.f32.xlu1 %v707_v3 }
 0x140   : > { %v2097_v7 = vpop.f32.mrf.mxu0 }
 0x141   : > { %v710_v8 = vmax.f32 %v2094_v5, %v2097_v7 }
 0x142   : > { %v2102_v10 = vpop.f32.mrf.mxu0 }
 0x143   : > { %711 = vmax.xlane.f32.xlu0 %v710_v8 }
 0x144   : > { %v2105_v12 = vpop.f32.mrf.mxu0 }
 0x145   : > { %v713_v13 = vmax.f32 %v2102_v10, %v2105_v12 }
 0x146   : > { %v2109_v14 = vpop.f32.mrf.mxu0 }
 0x147   : > { %714 = vmax.xlane.f32.xlu1 %v713_v13 }
 0x148   : > { %v2111_v15 = vpop.f32.mrf.mxu0 }
 0x149   : > { %v716_v16 = vmax.f32 %v2109_v14, %v2111_v15 }
 0x14a   : > { %v2115_v17 = vpop.f32.mrf.mxu0 }
 0x14b   : > { %717 = vmax.xlane.f32.xlu0 %v716_v16 }
 0x14c   : > { %v2117_v18 = vpop.f32.mrf.mxu0 }
 0x14d   : > { %v719_v19 = vmax.f32 %v2115_v17, %v2117_v18 }
 0x14e   : > { %v2121_v20 = vpop.f32.mrf.mxu0 }
 0x14f   : > { %720 = vmax.xlane.f32.xlu1 %v719_v19 }
 0x150   : > { %v2123_v21 = vpop.f32.mrf.mxu0 }
 0x151   : > { %v722_v22 = vmax.f32 %v2121_v20, %v2123_v21 }
 0x152   : > { %v2127_v23 = vpop.f32.mrf.mxu0 }
 0x153   : > { %723 = vmax.xlane.f32.xlu0 %v722_v22 }
 0x154   : > { %v2129_v24 = vpop.f32.mrf.mxu0 }
 0x155   : > { %v725_v25 = vmax.f32 %v2127_v23, %v2129_v24 }
 0x156   : > { %v2133_v26 = vpop.f32.mrf.mxu0 }
 0x157   : > { %726 = vmax.xlane.f32.xlu1 %v725_v25 }
 0x158   : > { %v2135_v27 = vpop.f32.mrf.mxu0 }
 0x159   : > { %v728_v28 = vmax.f32 %v2133_v26, %v2135_v27 }
 0x15a   : > { %v2139_v29 = vpop.f32.mrf.mxu0 }
 0x15b   : > { %729 = vmax.xlane.f32.xlu0 %v728_v28 }
 0x15c   : > { %v2141_v30 = vpop.f32.mrf.mxu0 }
 0x15d   : > { %v731_v31 = vmax.f32 %v2139_v29, %v2141_v30 }
 0x15f   : > { %732 = vmax.xlane.f32.xlu1 %v731_v31 }
 0x1ac   : > { %v688_v32 = vpop.xlane.xlu0 %687 }
 0x1ad   : > { %v734_v33 = vsub.f32 %v2037_v36, %v688_v32  ;;  %v735_v34 = vsub.f32 %v2039_v37, %v688_v32 }
 0x1af   : > { %v766_v35 = vmul.f32 1.442695, %v734_v33  ;;  %v768_v38 = vmul.f32 1.442695, %v735_v34 }
 0x1b0   : > { %v691_v41 = vpop.xlane.xlu0 %690 }
 0x1b1   : > { %1647 = vpow2.f32 %v766_v35  ;;  %v736_v44 = vsub.f32 %v2043_v39, %v691_v41  ;;  %v737_v47 = vsub.f32 %v2045_v40, %v691_v41 }
 0x1b2   : > { %1649 = vpow2.f32 %v768_v38 }
 0x1b3   : > { %v770_v48 = vmul.f32 1.442695, %v736_v44  ;;  %v772_v50 = vmul.f32 1.442695, %v737_v47 }
 0x1b4   : > { %v694_v52 = vpop.xlane.xlu1 %693 }
 0x1b5   : > { %1651 = vpow2.f32 %v770_v48  ;;  %v738_v53 = vsub.f32 %v2049_v42, %v694_v52  ;;  %v739_v55 = vsub.f32 %v2051_v43, %v694_v52 }
 0x1b6   : > { %1653 = vpow2.f32 %v772_v50 }
 0x1b7   : > { %v774_v36 = vmul.f32 1.442695, %v738_v53  ;;  %v776_v37 = vmul.f32 1.442695, %v739_v55 }
 0x1b8   : > { %v697_v57 = vpop.xlane.xlu1 %696 }
 0x1b9   : > { %1655 = vpow2.f32 %v774_v36  ;;  %v740_v58 = vsub.f32 %v2055_v45, %v697_v57  ;;  %v741_v39 = vsub.f32 %v2057_v46, %v697_v57 }
 0x1ba   : > { %1657 = vpow2.f32 %v776_v37 }
 0x1bb   : > { %v778_v40 = vmul.f32 1.442695, %v740_v58  ;;  %v780_v60 = vmul.f32 1.442695, %v741_v39 }
 0x1bc   : > { %v700_v62 = vpop.xlane.xlu0 %699 }
 0x1bd   : > { %1659 = vpow2.f32 %v778_v40  ;;  %v742_v63 = vsub.f32 %v2062_v49, %v700_v62  ;;  %v743_v42 = vsub.f32 %v2065_v51, %v700_v62 }
 0x1be   : > { %v1648_v1 = vpop.eup %1647  ;;  %1661 = vpow2.f32 %v780_v60 }
 0x1bf   : > { %v1650_v43 = vpop.eup %1649  ;;  %v782_v3 = vmul.f32 1.442695, %v742_v63  ;;  %v784_v4 = vmul.f32 1.442695, %v743_v42 }
 0x1c0   : > { %v703_v6 = vpop.xlane.xlu1 %702  ;;  %v830_v8 = vadd.f32 %v1650_v43, %v1648_v1 }
 0x1c1   : > { %1663 = vpow2.f32 %v782_v3  ;;  %v744_v45 = vsub.f32 %v2070_v54, %v703_v6  ;;  %v745_v46 = vsub.f32 %v2073_v56, %v703_v6 }
 0x1c2   : > { %v1652_v9 = vpop.eup %1651  ;;  %1665 = vpow2.f32 %v784_v4  ;;  %831 = vadd.xlane.f32.xlu0 %v830_v8 }
 0x1c3   : > { %v1654_v11 = vpop.eup %1653  ;;  %v786_v13 = vmul.f32 1.442695, %v744_v45  ;;  %v788_v49 = vmul.f32 1.442695, %v745_v46  ;;  %v878_v16 = vpack.c.bf16 %v1652_v9, %v1648_v1 }
 0x1c4   : > { %v706_v51 = vpop.xlane.xlu0 %705  ;;  %v879_v19 = vpack.c.bf16 %v1654_v11, %v1650_v43  ;;  %v833_v22 = vadd.f32 %v1654_v11, %v1652_v9 }
 0x1c5   : > { %1667 = vpow2.f32 %v786_v13  ;;  %v746_v25 = vsub.f32 %v2078_v59, %v706_v51  ;;  %v747_v28 = vsub.f32 %v2081_v61, %v706_v51 }
 0x1c6   : > { %v1656_v31 = vpop.eup %1655  ;;  %1669 = vpow2.f32 %v788_v49  ;;  %1054 = vmatprep.mubr.bf16.mxu1 %v879_v19  ;;  %834 = vadd.xlane.f32.xlu1 %v833_v22 }
 0x1c7   : > { %v1658_v54 = vpop.eup %1657  ;;  %v790_v56 = vmul.f32 1.442695, %v746_v25  ;;  %v792_v32 = vmul.f32 1.442695, %v747_v28  ;;  %1055 = vmatmul.mubr.bf16.vlgmr.msra.gmra.mxu1 %v878_v16 }
 0x1c8   : > { %v709_v33 = vpop.xlane.xlu1 %708  ;;  %v836_v34 = vadd.f32 %v1658_v54, %v1656_v31 }
 0x1c9   : > { %1671 = vpow2.f32 %v790_v56  ;;  %v748_v35 = vsub.f32 %v2086_v0, %v709_v33  ;;  %v749_v38 = vsub.f32 %v2089_v2, %v709_v33 }
 0x1ca   : > { %v1660_v41 = vpop.eup %1659  ;;  %1673 = vpow2.f32 %v792_v32  ;;  %837 = vadd.xlane.f32.xlu0 %v836_v34 }
 0x1cb   : > { %v1662_v59 = vpop.eup %1661  ;;  %v794_v61 = vmul.f32 1.442695, %v748_v35  ;;  %v796_v44 = vmul.f32 1.442695, %v749_v38  ;;  %v880_v47 = vpack.c.bf16 %v1660_v41, %v1656_v31 }
 0x1cc   : > { %v712_v48 = vpop.xlane.xlu0 %711  ;;  %v881_v50 = vpack.c.bf16 %v1662_v59, %v1658_v54  ;;  %v839_v52 = vadd.f32 %v1662_v59, %v1660_v41 }
 0x1cd   : > { %1675 = vpow2.f32 %v794_v61  ;;  %v750_v53 = vsub.f32 %v2094_v5, %v712_v48  ;;  %v751_v55 = vsub.f32 %v2097_v7, %v712_v48 }
 0x1ce   : > { %v1664_v36 = vpop.eup %1663  ;;  %1677 = vpow2.f32 %v796_v44  ;;  %1062 = vmatprep.mubr.bf16.mxu1 %v881_v50  ;;  %840 = vadd.xlane.f32.xlu1 %v839_v52 }
 0x1cf   : > { %v1666_v0 = vpop.eup %1665  ;;  %v798_v2 = vmul.f32 1.442695, %v750_v53  ;;  %v800_v37 = vmul.f32 1.442695, %v751_v55  ;;  %1063 = vmatmul.mubr.bf16.gmra.mxu1 %v880_v47 }
 0x1d0   : > { %v715_v57 = vpop.xlane.xlu1 %714  ;;  %v842_v58 = vadd.f32 %v1666_v0, %v1664_v36 }
 0x1d1   : > { %1679 = vpow2.f32 %v798_v2  ;;  %v752_v39 = vsub.f32 %v2102_v10, %v715_v57  ;;  %v753_v40 = vsub.f32 %v2105_v12, %v715_v57 }
 0x1d2   : > { %v1668_v60 = vpop.eup %1667  ;;  %1681 = vpow2.f32 %v800_v37  ;;  %843 = vadd.xlane.f32.xlu0 %v842_v58 }
 0x1d3   : > { %v1670_v5 = vpop.eup %1669  ;;  %v802_v7 = vmul.f32 1.442695, %v752_v39  ;;  %v804_v62 = vmul.f32 1.442695, %v753_v40  ;;  %v882_v63 = vpack.c.bf16 %v1668_v60, %v1664_v36 }
 0x1d4   : > { %v718_v42 = vpop.xlane.xlu0 %717  ;;  %v883_v1 = vpack.c.bf16 %v1670_v5, %v1666_v0  ;;  %v845_v43 = vadd.f32 %v1670_v5, %v1668_v60 }
 0x1d5   : > { %1683 = vpow2.f32 %v802_v7  ;;  %v754_v3 = vsub.f32 %v2109_v14, %v718_v42  ;;  %v755_v4 = vsub.f32 %v2111_v15, %v718_v42 }
 0x1d6   : > { %v1672_v6 = vpop.eup %1671  ;;  %1685 = vpow2.f32 %v804_v62  ;;  %1070 = vmatprep.mubr.bf16.mxu1 %v883_v1  ;;  %846 = vadd.xlane.f32.xlu1 %v845_v43 }
 0x1d7   : > { %v1674_v10 = vpop.eup %1673  ;;  %v806_v12 = vmul.f32 1.442695, %v754_v3  ;;  %v808_v8 = vmul.f32 1.442695, %v755_v4  ;;  %1071 = vmatmul.mubr.bf16.gmra.mxu1 %v882_v63 }
 0x1d8   : > { %v721_v45 = vpop.xlane.xlu1 %720  ;;  %v848_v46 = vadd.f32 %v1674_v10, %v1672_v6 }
 0x1d9   : > { %1687 = vpow2.f32 %v806_v12  ;;  %v756_v9 = vsub.f32 %v2115_v17, %v721_v45  ;;  %v757_v11 = vsub.f32 %v2117_v18, %v721_v45 }
 0x1da   : > { %v1676_v13 = vpop.eup %1675  ;;  %1689 = vpow2.f32 %v808_v8  ;;  %849 = vadd.xlane.f32.xlu0 %v848_v46 }
 0x1db   : > { %v1678_v14 = vpop.eup %1677  ;;  %v810_v15 = vmul.f32 1.442695, %v756_v9  ;;  %v812_v49 = vmul.f32 1.442695, %v757_v11  ;;  %v884_v16 = vpack.c.bf16 %v1676_v13, %v1672_v6 }
 0x1dc   : > { %v724_v51 = vpop.xlane.xlu0 %723  ;;  %v885_v19 = vpack.c.bf16 %v1678_v14, %v1674_v10  ;;  %v851_v22 = vadd.f32 %v1678_v14, %v1676_v13 }
 0x1dd   : > { %1691 = vpow2.f32 %v810_v15  ;;  %v758_v25 = vsub.f32 %v2121_v20, %v724_v51  ;;  %v759_v28 = vsub.f32 %v2123_v21, %v724_v51 }
 0x1de   : > { %v1680_v31 = vpop.eup %1679  ;;  %1693 = vpow2.f32 %v812_v49  ;;  %1078 = vmatprep.mubr.bf16.mxu1 %v885_v19  ;;  %852 = vadd.xlane.f32.xlu1 %v851_v22  ;;  %v1169_v22 = vld [vmem:[%s2182_s28] sm:$0xff] }
 0x1df   : > { %v1682_v17 = vpop.eup %1681  ;;  %v814_v18 = vmul.f32 1.442695, %v758_v25  ;;  %v816_v54 = vmul.f32 1.442695, %v759_v28  ;;  %1079 = vmatmul.mubr.bf16.gmra.mxu1 %v884_v16  ;;  %v2184_v16 = vstv %s1151_s14  ;;  %s2266_s14 = scalar_lea.sflag [#allocation4], %s297_s18 }
 0x1e0   : > { %v727_v56 = vpop.xlane.xlu1 %726  ;;  %v854_v32 = vadd.f32 %v1682_v17, %v1680_v31 }
 0x1e1   : > { %1695 = vpow2.f32 %v814_v18  ;;  %v760_v33 = vsub.f32 %v2127_v23, %v727_v56  ;;  %v761_v34 = vsub.f32 %v2129_v24, %v727_v56 }
 0x1e2   : > { %v1684_v35 = vpop.eup %1683  ;;  %1697 = vpow2.f32 %v816_v54  ;;  %855 = vadd.xlane.f32.xlu0 %v854_v32 }
 0x1e3   : > { %v1686_v20 = vpop.eup %1685  ;;  %v818_v21 = vmul.f32 1.442695, %v760_v33  ;;  %v820_v38 = vmul.f32 1.442695, %v761_v34  ;;  %v886_v41 = vpack.c.bf16 %v1684_v35, %v1680_v31  ;;  %v1170_v33 = vld [vmem:[%s2182_s28 + $0x8] sm:$0xff] }
 0x1e4   : > { %v730_v59 = vpop.xlane.xlu0 %729  ;;  %v887_v61 = vpack.c.bf16 %v1686_v20, %v1682_v17  ;;  %v857_v44 = vadd.f32 %v1686_v20, %v1684_v35 }
 0x1e5   : > { %1699 = vpow2.f32 %v818_v21  ;;  %v762_v47 = vsub.f32 %v2133_v26, %v730_v59  ;;  %v763_v48 = vsub.f32 %v2135_v27, %v730_v59 }
 0x1e6   : > { %v1688_v50 = vpop.eup %1687  ;;  %1701 = vpow2.f32 %v820_v38  ;;  %1086 = vmatprep.mubr.bf16.mxu1 %v887_v61  ;;  %858 = vadd.xlane.f32.xlu1 %v857_v44  ;;  %v1171_v44 = vld [vmem:[%s2182_s28 + $0x10] sm:$0xff] }
 0x1e7   : > { %v1690_v23 = vpop.eup %1689  ;;  %v822_v24 = vmul.f32 1.442695, %v762_v47  ;;  %v824_v52 = vmul.f32 1.442695, %v763_v48  ;;  %1087 = vmatmul.mubr.bf16.gmra.mxu1 %v886_v41 }
 0x1e8   : > { %v733_v53 = vpop.xlane.xlu1 %732  ;;  %v860_v55 = vadd.f32 %v1690_v23, %v1688_v50 }
 0x1e9   : > { %1703 = vpow2.f32 %v822_v24  ;;  %v764_v36 = vsub.f32 %v2139_v29, %v733_v53  ;;  %v765_v0 = vsub.f32 %v2141_v30, %v733_v53 }
 0x1ea   : > { %v1692_v2 = vpop.eup %1691  ;;  %1705 = vpow2.f32 %v824_v52  ;;  %861 = vadd.xlane.f32.xlu0 %v860_v55 }
 0x1eb   : > { %v1694_v26 = vpop.eup %1693  ;;  %v826_v27 = vmul.f32 1.442695, %v764_v36  ;;  %v828_v37 = vmul.f32 1.442695, %v765_v0  ;;  %v888_v57 = vpack.c.bf16 %v1692_v2, %v1688_v50  ;;  %v1172_v36 = vld [vmem:[%s2182_s28 + $0x18] sm:$0xff] }
 0x1ec   : > { %v889_v58 = vpack.c.bf16 %v1694_v26, %v1690_v23  ;;  %v863_v39 = vadd.f32 %v1694_v26, %v1692_v2 }
 0x1ed   : > { %1707 = vpow2.f32 %v826_v27 }
 0x1ee   : > { %v1696_v40 = vpop.eup %1695  ;;  %1709 = vpow2.f32 %v828_v37  ;;  %1094 = vmatprep.mubr.bf16.mxu1 %v889_v58  ;;  %864 = vadd.xlane.f32.xlu1 %v863_v39 }
 0x1ef   : > { %v1698_v60 = vpop.eup %1697  ;;  %1095 = vmatmul.mubr.bf16.gmra.mxu1 %v888_v57 }
 0x1f0   : > { %v866_v5 = vadd.f32 %v1698_v60, %v1696_v40 }
 0x1f2   : > { %v1700_v29 = vpop.eup %1699  ;;  %867 = vadd.xlane.f32.xlu0 %v866_v5 }
 0x1f3   : > { %v1702_v30 = vpop.eup %1701  ;;  %v890_v7 = vpack.c.bf16 %v1700_v29, %v1696_v40  ;;  %v1173_v40 = vld [vmem:[%s2182_s28 + $0x20] sm:$0xff] }
 0x1f4   : > { %v891_v62 = vpack.c.bf16 %v1702_v30, %v1698_v60  ;;  %v869_v63 = vadd.f32 %v1702_v30, %v1700_v29 }
 0x1f6   : > { %v1704_v42 = vpop.eup %1703  ;;  %1102 = vmatprep.mubr.bf16.mxu1 %v891_v62  ;;  %870 = vadd.xlane.f32.xlu1 %v869_v63 }
 0x1f7   : > { %v1706_v1 = vpop.eup %1705  ;;  %1103 = vmatmul.mubr.bf16.gmra.mxu1 %v890_v7 }
 0x1f8   : > { %v872_v43 = vadd.f32 %v1706_v1, %v1704_v42 }
 0x1fa   : > { %v1708_v3 = vpop.eup %1707  ;;  %873 = vadd.xlane.f32.xlu0 %v872_v43 }
 0x1fb   : > { %v1710_v4 = vpop.eup %1709  ;;  %v892_v6 = vpack.c.bf16 %v1708_v3, %v1704_v42 }
 0x1fc   : > { %v893_v10 = vpack.c.bf16 %v1710_v4, %v1706_v1  ;;  %v875_v12 = vadd.f32 %v1710_v4, %v1708_v3  ;;  %v1174_v1 = vld [vmem:[%s2182_s28 + $0x28] sm:$0xff] }
 0x1fe   : > { %1110 = vmatprep.mubr.bf16.mxu1 %v893_v10  ;;  %876 = vadd.xlane.f32.xlu1 %v875_v12 }
 0x1ff   : > { %1111 = vmatmul.mubr.bf16.gmra.mxu1 %v892_v6 }
 0x24b   : > { %v832_v8 = vpop.xlane.xlu0 %831 }
 0x24c   : > { %1711 = vrcp.f32 %v832_v8 }
 0x24f   : > { %v835_v45 = vpop.xlane.xlu1 %834 }
 0x250   : > { %1713 = vrcp.f32 %v835_v45 }
 0x253   : > { %v838_v46 = vpop.xlane.xlu0 %837 }
 0x254   : > { %1715 = vrcp.f32 %v838_v46  ;;  %v1175_v46 = vld [vmem:[%s2182_s28 + $0x30] sm:$0xff] }
 0x257   : > { %v841_v9 = vpop.xlane.xlu1 %840 }
 0x258   : > { %1717 = vrcp.f32 %v841_v9 }
 0x259   : > { %v1712_v15 = vpop.eup %1711 }
 0x25b   : > { %v844_v49 = vpop.xlane.xlu0 %843 }
 0x25c   : > { %1719 = vrcp.f32 %v844_v49 }
 0x25d   : > { %v1714_v17 = vpop.eup %1713 }
 0x25f   : > { %v847_v18 = vpop.xlane.xlu1 %846 }
 0x260   : > { %1721 = vrcp.f32 %v847_v18 }
 0x261   : > { %v1716_v21 = vpop.eup %1715 }
 0x263   : > { %v850_v38 = vpop.xlane.xlu0 %849 }
 0x264   : > { %1723 = vrcp.f32 %v850_v38 }
 0x265   : > { %v1718_v23 = vpop.eup %1717 }
 0x267   : > { %v853_v24 = vpop.xlane.xlu1 %852 }
 0x268   : > { %1725 = vrcp.f32 %v853_v24 }
 0x269   : > { %v1720_v27 = vpop.eup %1719 }
 0x26b   : > { %v856_v37 = vpop.xlane.xlu0 %855 }
 0x26c   : > { %1727 = vrcp.f32 %v856_v37 }
 0x26d   : > { %v1722_v30 = vpop.eup %1721 }
 0x26f   : > { %v859_v7 = vpop.xlane.xlu1 %858 }
 0x270   : > { %1729 = vrcp.f32 %v859_v7 }
 0x271   : > { %v1724_v6 = vpop.eup %1723 }
 0x273   : > { %v862_v10 = vpop.xlane.xlu0 %861 }
 0x274   : > { %1731 = vrcp.f32 %v862_v10 }
 0x27b   : > { %v868_v18 = vpop.xlane.xlu0 %867 }
 0x283   : > { %v874_v24 = vpop.xlane.xlu0 %873 }
 0x287   : > { %v1478_v11 = vpop.f32.mrf.mxu1 }
 0x289   : > { %v1479_v13 = vpop.f32.mrf.mxu1 }
 0x28a   : > { %v1480_v14 = vadd.f32 %v1479_v13, %v1478_v11 }
 0x28b   : > { %v1481_v51 = vpop.f32.mrf.mxu1 }
 0x28c   : > { %v1135_v19 = vmul.f32 %v1712_v15, %v1480_v14  ;;  %v1726_v14 = vpop.eup %1725  ;;  %v865_v15 = vpop.xlane.xlu1 %864 }
 0x28d   : > { %v1482_v25 = vpop.f32.mrf.mxu1  ;;  %1733 = vrcp.f32 %v865_v15 }
 0x28e   : > { %v1153_v28 = vmul.f32 %v2184_v16, %v1135_v19  ;;  %v1483_v31 = vadd.f32 %v1482_v25, %v1481_v51  ;;  %1735 = vrcp.f32 %v868_v18 }
 0x28f   : > { %v1484_v54 = vpop.f32.mrf.mxu1 }
 0x290   : > { %v1185_v56 = vadd.f32 %v1169_v22, %v1153_v28  ;;  %v1136_v32 = vmul.f32 %v1714_v17, %v1483_v31  ;;  %v1176_v22 = vld [vmem:[%s2182_s28 + $0x38] sm:$0xff]  ;;  %v1728_v17 = vpop.eup %1727  ;;  %v871_v38 = vpop.xlane.xlu1 %870 }
 0x291   : > { %v1485_v34 = vpop.f32.mrf.mxu1  ;;  %1737 = vrcp.f32 %v871_v38 }
 0x292   : > { %1202 = vst.msk [vmem:[%s2191_s6] sm:$0xff] %vm1201_vm1, %v1185_v56  ;;  %v1154_v35 = vmul.f32 %v2184_v16, %v1136_v32  ;;  %v1486_v20 = vadd.f32 %v1485_v34, %v1484_v54  ;;  %1739 = vrcp.f32 %v874_v24 }
 0x293   : > { %v1487_v41 = vpop.f32.mrf.mxu1 }
 0x294   : > { %v1186_v59 = vadd.f32 %v1170_v33, %v1154_v35  ;;  %v1137_v61 = vmul.f32 %v1716_v21, %v1486_v20  ;;  %v1177_v33 = vld [vmem:[%s2182_s28 + $0x40] sm:$0xff]  ;;  %v1730_v21 = vpop.eup %1729  ;;  %v877_v37 = vpop.xlane.xlu1 %876 }
 0x295   : > { %v1488_v47 = vpop.f32.mrf.mxu1  ;;  %1741 = vrcp.f32 %v877_v37 }
 0x296   : > { %1203 = vst.msk [vmem:[%s2191_s6 + $0x8] sm:$0xff] %vm1201_vm1, %v1186_v59  ;;  %v1155_v48 = vmul.f32 %v2184_v16, %v1137_v61  ;;  %v1489_v50 = vadd.f32 %v1488_v47, %v1487_v41 }
 0x297   : > { %v1490_v52 = vpop.f32.mrf.mxu1 }
 0x298   : > { %v1187_v53 = vadd.f32 %v1171_v44, %v1155_v48  ;;  %v1138_v55 = vmul.f32 %v1718_v23, %v1489_v50  ;;  %v1178_v44 = vld [vmem:[%s2182_s28 + $0x48] sm:$0xff]  ;;  %v1732_v23 = vpop.eup %1731 }
 0x299   : > { %v1491_v0 = vpop.f32.mrf.mxu1 }
 0x29a   : > { %1204 = vst.msk [vmem:[%s2191_s6 + $0x10] sm:$0xff] %vm1201_vm1, %v1187_v53  ;;  %v1156_v2 = vmul.f32 %v2184_v16, %v1138_v55  ;;  %v1492_v26 = vadd.f32 %v1491_v0, %v1490_v52 }
 0x29b   : > { %v1493_v57 = vpop.f32.mrf.mxu1 }
 0x29c   : > { %v1188_v58 = vadd.f32 %v1172_v36, %v1156_v2  ;;  %v1139_v39 = vmul.f32 %v1720_v27, %v1492_v26  ;;  %v1179_v36 = vld [vmem:[%s2182_s28 + $0x50] sm:$0xff]  ;;  %v1734_v27 = vpop.eup %1733 }
 0x29d   : > { %v1494_v60 = vpop.f32.mrf.mxu1 }
 0x29e   : > { %1205 = vst.msk [vmem:[%s2191_s6 + $0x18] sm:$0xff] %vm1201_vm1, %v1188_v58  ;;  %v1157_v5 = vmul.f32 %v2184_v16, %v1139_v39  ;;  %v1495_v29 = vadd.f32 %v1494_v60, %v1493_v57 }
 0x29f   : > { %v1496_v62 = vpop.f32.mrf.mxu1 }
 0x2a0   : > { %v1189_v63 = vadd.f32 %v1173_v40, %v1157_v5  ;;  %v1140_v42 = vmul.f32 %v1722_v30, %v1495_v29  ;;  %v1180_v40 = vld [vmem:[%s2182_s28 + $0x58] sm:$0xff]  ;;  %v1736_v30 = vpop.eup %1735 }
 0x2a1   : > { %v1497_v43 = vpop.f32.mrf.mxu1 }
 0x2a2   : > { %1206 = vst.msk [vmem:[%s2191_s6 + $0x20] sm:$0xff] %vm1201_vm1, %v1189_v63  ;;  %v1158_v3 = vmul.f32 %v2184_v16, %v1140_v42  ;;  %v1498_v4 = vadd.f32 %v1497_v43, %v1496_v62  ;;  %v1181_v42 = vld [vmem:[%s2182_s28 + $0x60] sm:$0xff] }
 0x2a3   : > { %v1499_v12 = vpop.f32.mrf.mxu1 }
 0x2a4   : > { %v1190_v8 = vadd.f32 %v1174_v1, %v1158_v3  ;;  %v1141_v45 = vmul.f32 %v1724_v6, %v1498_v4  ;;  %v1738_v4 = vpop.eup %1737 }
 0x2a5   : > { %v1500_v9 = vpop.f32.mrf.mxu1 }
 0x2a6   : > { %1207 = vst.msk [vmem:[%s2191_s6 + $0x28] sm:$0xff] %vm1201_vm1, %v1190_v8  ;;  %v1159_v11 = vmul.f32 %v2184_v16, %v1141_v45  ;;  %v1501_v13 = vadd.f32 %v1500_v9, %v1499_v12  ;;  %v1182_v8 = vld [vmem:[%s2182_s28 + $0x68] sm:$0xff] }
 0x2a7   : > { %v1502_v49 = vpop.f32.mrf.mxu1 }
 0x2a8   : > { %v1191_v51 = vadd.f32 %v1175_v46, %v1159_v11  ;;  %v1142_v19 = vmul.f32 %v1726_v14, %v1501_v13  ;;  %v1740_v11 = vpop.eup %1739 }
 0x2a9   : > { %v1503_v25 = vpop.f32.mrf.mxu1 }
 0x2aa   : > { %1208 = vst.msk [vmem:[%s2191_s6 + $0x30] sm:$0xff] %vm1201_vm1, %v1191_v51  ;;  %v1160_v28 = vmul.f32 %v2184_v16, %v1142_v19  ;;  %v1504_v31 = vadd.f32 %v1503_v25, %v1502_v49  ;;  %v1183_v49 = vld [vmem:[%s2182_s28 + $0x70] sm:$0xff]  ;;  %v1742_v25 = vpop.eup %1741 }
 0x2ab   : > { %v1505_v54 = vpop.f32.mrf.mxu1 }
 0x2ac   : > { %v1192_v56 = vadd.f32 %v1176_v22, %v1160_v28  ;;  %v1143_v32 = vmul.f32 %v1728_v17, %v1504_v31  ;;  %v1184_v17 = vld [vmem:[%s2182_s28 + $0x78] sm:$0xff]  ;;  %s1749_s28 = scalar_lea.vmem %s1748_s23, 4096 }
 0x2ad   : > { %v1506_v34 = vpop.f32.mrf.mxu1  ;;  %p1751_p5 = scmp.lt.s32.totalorder %s1749_s28, %s1743_s15 }
 0x2ae   : > { %1209 = vst.msk [vmem:[%s2191_s6 + $0x38] sm:$0xff] %vm1201_vm1, %v1192_v56  ;;  %v1161_v35 = vmul.f32 %v2184_v16, %v1143_v32  ;;  %v1507_v20 = vadd.f32 %v1506_v34, %v1505_v54 }
 0x2af   : > { %v1508_v41 = vpop.f32.mrf.mxu1  ;;  %p1752_p6 = por %p1751_p5, %p1750_p4 }
 0x2b0   : > { %v1193_v59 = vadd.f32 %v1177_v33, %v1161_v35  ;;  %v1144_v61 = vmul.f32 %v1730_v21, %v1507_v20 }
 0x2b1   : > { %v1509_v47 = vpop.f32.mrf.mxu1  ;;  %p1753_p7 = pnand %p1752_p6, %p1746_p2 }
 0x2b2   : > { %1210 = vst.msk [vmem:[%s2191_s6 + $0x40] sm:$0xff] %vm1201_vm1, %v1193_v59  ;;  %v1162_v48 = vmul.f32 %v2184_v16, %v1144_v61  ;;  %v1510_v50 = vadd.f32 %v1509_v47, %v1508_v41 }
 0x2b3   : > { %v1511_v52 = vpop.f32.mrf.mxu1 }
 0x2b4   : > { %v1194_v53 = vadd.f32 %v1178_v44, %v1162_v48  ;;  %v1145_v55 = vmul.f32 %v1732_v23, %v1510_v50 }
 0x2b5   : > { %v1512_v0 = vpop.f32.mrf.mxu1 }
 0x2b6   : > { %1211 = vst.msk [vmem:[%s2191_s6 + $0x48] sm:$0xff] %vm1201_vm1, %v1194_v53  ;;  %v1163_v2 = vmul.f32 %v2184_v16, %v1145_v55  ;;  %v1513_v26 = vadd.f32 %v1512_v0, %v1511_v52 }
 0x2b7   : > { %v1514_v57 = vpop.f32.mrf.mxu1 }
 0x2b8   : > { %v1195_v58 = vadd.f32 %v1179_v36, %v1163_v2  ;;  %v1146_v39 = vmul.f32 %v1734_v27, %v1513_v26 }
 0x2b9   : > { %v1515_v60 = vpop.f32.mrf.mxu1 }
 0x2ba   : > { %1212 = vst.msk [vmem:[%s2191_s6 + $0x50] sm:$0xff] %vm1201_vm1, %v1195_v58  ;;  %v1164_v5 = vmul.f32 %v2184_v16, %v1146_v39  ;;  %v1516_v29 = vadd.f32 %v1515_v60, %v1514_v57 }
 0x2bb   : > { %v1517_v7 = vpop.f32.mrf.mxu1 }
 0x2bc   : > { %v1196_v62 = vadd.f32 %v1180_v40, %v1164_v5  ;;  %v1147_v63 = vmul.f32 %v1736_v30, %v1516_v29 }
 0x2bd   : > { %v1518_v1 = vpop.f32.mrf.mxu1 }
 0x2be   : > { %1213 = vst.msk [vmem:[%s2191_s6 + $0x58] sm:$0xff] %vm1201_vm1, %v1196_v62  ;;  %v1165_v43 = vmul.f32 %v2184_v16, %v1147_v63  ;;  %v1519_v3 = vadd.f32 %v1518_v1, %v1517_v7 }
 0x2bf   : > { %v1520_v6 = vpop.f32.mrf.mxu1 }
 0x2c0   : > { %v1197_v10 = vadd.f32 %v1181_v42, %v1165_v43  ;;  %v1148_v12 = vmul.f32 %v1738_v4, %v1519_v3 }
 0x2c1   : > { %v1521_v45 = vpop.f32.mrf.mxu1 }
 0x2c2   : > { %1214 = vst.msk [vmem:[%s2191_s6 + $0x60] sm:$0xff] %vm1201_vm1, %v1197_v10  ;;  %v1166_v46 = vmul.f32 %v2184_v16, %v1148_v12  ;;  %v1522_v9 = vadd.f32 %v1521_v45, %v1520_v6 }
 0x2c3   : > { %v1523_v13 = vpop.f32.mrf.mxu1 }
 0x2c4   : > { %v1198_v14 = vadd.f32 %v1182_v8, %v1166_v46  ;;  %v1149_v15 = vmul.f32 %v1740_v11, %v1522_v9 }
 0x2c5   : > { %v1524_v51 = vpop.f32.mrf.mxu1 }
 0x2c6   : > { %1215 = vst.msk [vmem:[%s2191_s6 + $0x68] sm:$0xff] %vm1201_vm1, %v1198_v14  ;;  %v1167_v19 = vmul.f32 %v2184_v16, %v1149_v15  ;;  %v1525_v22 = vadd.f32 %v1524_v51, %v1523_v13 }
 0x2c8   : > { %v1199_v28 = vadd.f32 %v1183_v49, %v1167_v19  ;;  %v1150_v31 = vmul.f32 %v1742_v25, %v1525_v22 }
 0x2ca   : > { %1216 = vst.msk [vmem:[%s2191_s6 + $0x70] sm:$0xff] %vm1201_vm1, %v1199_v28  ;;  %v1168_v18 = vmul.f32 %v2184_v16, %v1150_v31 }
 0x2cc   : > { %v1200_v54 = vadd.f32 %v1184_v17, %v1168_v18 }
 0x2ce   : > { %1217 = vst.msk [vmem:[%s2191_s6 + $0x78] sm:$0xff] %vm1201_vm1, %v1200_v54 }
 0x2cf   : > { %1756 = shalt.err (!%p1753_p7)
}
 0x2d0   : > { %s1757_s18 = scalar_lea.hbm %s2255_s17, 2048  ;;  %s1761_s9 = scalar_lea.hbm %s2322_s5, 8192 }
 0x2d1   : > { %p1758_p9 = scmp.ne.s32.totalorder %s2255_s17, %s1757_s18  ;;  %p1762_p12 = scmp.lt.s32.totalorder %s2255_s17, %s2322_s5 }
 0x2d2   : > { %p1763_p13 = scmp.lt.s32.totalorder %s1761_s9, %s1757_s18 }
 0x2d3   : > { %p1759_p10 = pnand %p1758_p9, %p1924_p3 }
 0x2d4   : > { %p1764_p0 = por %p1763_p13, %p1762_p12 }
 0x2d5   : > { %p1760_p11 = pneg %p1759_p10 }
 0x2d7   : > { %p1765_p1 = pnand %p1764_p0, %p1760_p11 }
 0x2d9   : > { %1768 = shalt.err (!%p1765_p1)
}
 0x2da   : > { %s1838_s16 = smov 128   ;;  %s1839_s13 = smov 8  }
 0x2db   : > { %1534 = dma.vmem_to_hbm [thread:$0]  (%p1924_p3), %s2260_s11, 2048, %s2255_s17, %s2266_s14, %s1838_s16, %s1838_s16, %s1839_s13  }
 0x2dc PF: > { %p1540_p2 = scmp.ge.s32.totalorder %s1835_s27, 2  ;;  %s1249_s15 = sand.u32 1, %s1807_s20  }
 0x2dd   : > { %s1250_s19 = scalar_lea.sflag [#allocation4], %s1249_s15 }
 0x2de   : > { %p1537_p4 = pnand %p1540_p2, %p1933_p8 }
 0x2e0   : > { %p1538_p5 = pneg %p1537_p4 }
 0x2e2   : > { %1802 = dma.done.wait (%p1538_p5), %s1250_s19, 2048  }
 0x2e3   : > { %1804 = vsyncadd (%p1538_p5), %s1250_s19, 4294965248  ;;  %s19_s27 = sadd.s32 1, %s1835_s27   ;;  %s2325_s20 = smov %s1811_s21 }
 0x2e4   : > { %p16_p6 = scmp.ge.s32.totalorder %s19_s27, 6   ;;  %s2326_s21 = smov %s1815_s22 }
 0x2e5   : > { %s2327_s22 = smov %s1942_s12  ;;  %s2328_s23 = smov %s1827_s25 }
 0x2e6   : > { %s2329_s24 = smov %s1831_s26  ;;  %s2330_s25 = smov %s2333_s29 }
 0x2e7   : > { %s2331_s26 = smov %s2337_s30  ;;  %18 = sbr.rel (!%p16_p6) target bundleno = 7 (0x7), region = 84 }
 0x2ec   :  { %1255 = vsyncpa [#allocation4], 1 }
 0x2ed   :  { %1257 = vsyncpa [#allocation4 + $0x1], 1 }

</bundles_post_ra>
